<compile_context>
chip_gen: v5e
topology: v5e:2x2
jax: 0.10.0
libtpu: 0.0.40
codegen_flags: <defaults>
</compile_context>

<pallas_src>
import functools

import jax
import jax.numpy as jnp
from jax.experimental import pallas as pl
from jax.experimental.pallas import tpu as pltpu


def _round_up(x, m):
    return ((x + m - 1) // m) * m


# ---------------------------------------------------------------------------
# Pallas kernel: tiled GEMM (bf16 MXU, f32 accumulate) + bias + LeakyReLU(0.2)
# ---------------------------------------------------------------------------
def _gemm_bias_act_kernel(x_ref, w_ref, b_ref, o_ref, acc_ref, *, leaky):
    # x_ref: (tm, tk) bf16   w_ref: (tk, tn) bf16   b_ref: (1, tn) f32
    # o_ref: (tm, tn)        acc_ref: (tm, tn) f32 scratch (persists over k)
    k = pl.program_id(2)

    @pl.when(k == 0)
    def _():
        acc_ref[...] = jnp.zeros_like(acc_ref)

    acc_ref[...] += jnp.dot(x_ref[...], w_ref[...], preferred_element_type=jnp.float32)

    @pl.when(k == pl.num_programs(2) - 1)
    def _():
        out = acc_ref[...] + b_ref[...]
        if leaky:
            out = jnp.where(out >= 0.0, out, 0.2 * out)
        o_ref[...] = out.astype(o_ref.dtype)


def gemm_bias_act(patches, wmat, bias, *, leaky, out_dtype=jnp.bfloat16):
    """(M,K) @ (K,Cout) + bias with fused LeakyReLU(0.2) as a tiled MXU GEMM.

    Inputs are zero-padded so K and Cout are multiples of 128 (lane-dense blocks,
    full MXU width) and M is a multiple of the row tile; padding is sliced off.
    """
    M, K = patches.shape
    Cout = wmat.shape[1]

    # Tile sizes: tn/tk multiples of 128 (lane axis / MXU native), tm multiple of 8.
    tn = 256 if Cout > 128 else 128
    tk = 256 if K > 128 else 128
    tm = 256 if M > 256 else _round_up(M, 8)

    M_pad = _round_up(M, tm)
    K_pad = _round_up(K, tk)
    N_pad = _round_up(Cout, tn)

    x_p = jnp.pad(patches.astype(jnp.bfloat16), ((0, M_pad - M), (0, K_pad - K)))
    w_p = jnp.pad(wmat.astype(jnp.bfloat16), ((0, K_pad - K), (0, N_pad - Cout)))
    b_p = jnp.pad(bias.astype(jnp.float32), (0, N_pad - Cout)).reshape(1, N_pad)

    grid = (M_pad // tm, N_pad // tn, K_pad // tk)
    kernel = functools.partial(_gemm_bias_act_kernel, leaky=leaky)

    cost = pl.CostEstimate(
        flops=2 * M_pad * K_pad * N_pad,
        transcendentals=0,
        bytes_accessed=(M_pad * K_pad * 2            # bf16 patches
                        + K_pad * N_pad * 2          # bf16 weights
                        + M_pad * N_pad * jnp.dtype(out_dtype).itemsize
                        + N_pad * 4),                # bias
    )

    out = pl.pallas_call(
        kernel,
        out_shape=jax.ShapeDtypeStruct((M_pad, N_pad), out_dtype),
        grid_spec=pltpu.PrefetchScalarGridSpec(
            num_scalar_prefetch=0,
            grid=grid,
            in_specs=[
                pl.BlockSpec((tm, tk), lambda i, j, k: (i, k)),
                pl.BlockSpec((tk, tn), lambda i, j, k: (k, j)),
                pl.BlockSpec((1, tn), lambda i, j, k: (0, j)),
            ],
            out_specs=pl.BlockSpec((tm, tn), lambda i, j, k: (i, j)),
            scratch_shapes=[pltpu.VMEM((tm, tn), jnp.float32)],
        ),
        compiler_params=pltpu.CompilerParams(
            dimension_semantics=("parallel", "parallel", "arbitrary"),
            vmem_limit_bytes=32 * 1024 * 1024,
        ),
        cost_estimate=cost,
    )(x_p, w_p, b_p)
    return out[:M, :Cout]


# ---------------------------------------------------------------------------
# JAX glue: NHWC im2col, conv / conv-transpose wrappers around the Pallas GEMM
# ---------------------------------------------------------------------------
def _im2col_nhwc(x, kh, kw, stride):
    """x: (N, H, W, C), already padded. Returns (N*OH*OW, kh*kw*C), OH, OW.
    Column (K) order is (i, j, c): kernel-row major, kernel-col, then channel."""
    N, H, W, C = x.shape
    OH = (H - kh) // stride + 1
    OW = (W - kw) // stride + 1
    cols = []
    for i in range(kh):
        for j in range(kw):
            cols.append(x[:, i:i + stride * OH:stride, j:j + stride * OW:stride, :])
    patches = jnp.concatenate(cols, axis=-1)  # (N, OH, OW, kh*kw*C)
    return patches.reshape(N * OH * OW, kh * kw * C), OH, OW


def conv2d_nhwc(x, w, b, *, stride, padding, leaky, out_dtype=jnp.bfloat16):
    """PyTorch-style Conv2d in NHWC. x: (N,H,W,Cin), w: (Cout,Cin,kh,kw), b: (Cout,)."""
    N, H, W, Cin = x.shape
    Cout, _, kh, kw = w.shape
    xp = jnp.pad(x, ((0, 0), (padding, padding), (padding, padding), (0, 0)))
    patches, OH, OW = _im2col_nhwc(xp, kh, kw, stride)
    # Match the (i, j, c) column order of _im2col_nhwc: (kh, kw, Cin, Cout).
    wmat = jnp.transpose(w, (2, 3, 1, 0)).reshape(kh * kw * Cin, Cout)
    out = gemm_bias_act(patches, wmat, b, leaky=leaky, out_dtype=out_dtype)
    return out.reshape(N, OH, OW, Cout)


def conv_transpose2d_nhwc(x, w, b, *, stride, padding, leaky, out_dtype=jnp.bfloat16):
    """PyTorch-style ConvTranspose2d in NHWC.  w: (Cin, Cout, kh, kw).
    Implemented as zero-dilated input + stride-1 conv with flipped/transposed kernel."""
    # TODO(synk): replace zero-dilation with a sub-pixel (phase) decomposition to avoid
    #             ~stride^2 wasted MACs / im2col bytes on the deconv layer.
    N, H, W, Cin = x.shape
    _, Cout, kh, kw = w.shape
    Hd, Wd = (H - 1) * stride + 1, (W - 1) * stride + 1
    xd = jnp.zeros((N, Hd, Wd, Cin), x.dtype).at[:, ::stride, ::stride, :].set(x)
    # equivalent conv weight: W_conv[o, c, i, j] = w[c, o, kh-1-i, kw-1-j]
    w_conv = jnp.flip(w, axis=(2, 3)).transpose(1, 0, 2, 3)
    eff_pad = kh - 1 - padding
    return conv2d_nhwc(xd, w_conv, b, stride=1, padding=eff_pad,
                       leaky=leaky, out_dtype=out_dtype)


# ---------------------------------------------------------------------------
# Discriminator_FCN parameters + forward
# ---------------------------------------------------------------------------
def init_params(key, num_classes, ndf):
    def w_init(k, shape):
        return 0.02 * jax.random.normal(k, shape, dtype=jnp.float32)

    ks = jax.random.split(key, 12)
    return {
        "conv1_w": w_init(ks[0], (ndf, num_classes, 4, 4)),
        "conv1_b": w_init(ks[1], (ndf,)),
        "conv2_w": w_init(ks[2], (ndf * 2, ndf, 4, 4)),
        "conv2_b": w_init(ks[3], (ndf * 2,)),
        "conv3_w": w_init(ks[4], (ndf * 4, ndf * 2, 4, 4)),
        "conv3_b": w_init(ks[5], (ndf * 4,)),
        "conv4_w": w_init(ks[6], (ndf * 8, ndf * 4, 4, 4)),
        "conv4_b": w_init(ks[7], (ndf * 8,)),
        # ConvTranspose2d weight layout: (in_ch, out_ch, kh, kw)
        "deconv4_w": w_init(ks[8], (ndf * 8, ndf * 4, 4, 4)),
        "deconv4_b": w_init(ks[9], (ndf * 4,)),
        "cls_w": w_init(ks[10], (1, ndf * 4, 3, 3)),
        "cls_b": w_init(ks[11], (1,)),
    }


def discriminator_fcn_forward(params, x, label):
    # NCHW (PyTorch) at the boundary; NHWC + bf16 activations internally so channels
    # sit on the lane axis and no transpose is paid between layers.
    h = jnp.concatenate([x, label], axis=1)           # (N, C, H, W)
    h = jnp.transpose(h, (0, 2, 3, 1)).astype(jnp.bfloat16)  # NHWC
    h = conv2d_nhwc(h, params["conv1_w"], params["conv1_b"], stride=2, padding=1, leaky=True)
    h = conv2d_nhwc(h, params["conv2_w"], params["conv2_b"], stride=2, padding=1, leaky=True)
    h = conv2d_nhwc(h, params["conv3_w"], params["conv3_b"], stride=2, padding=1, leaky=True)
    h = conv2d_nhwc(h, params["conv4_w"], params["conv4_b"], stride=2, padding=1, leaky=True)
    h = conv_transpose2d_nhwc(h, params["deconv4_w"], params["deconv4_b"],
                              stride=2, padding=1, leaky=True)
    h = conv2d_nhwc(h, params["cls_w"], params["cls_b"], stride=1, padding=1,
                    leaky=False, out_dtype=jnp.float32)
    return jnp.transpose(h, (0, 3, 1, 2))             # back to NCHW


if __name__ == "__main__":
    # Small deterministic example: x has 2 channels, label has 2 channels,
    # so num_classes (= conv1 in_channels) = 4.  ndf kept small (8).
    num_classes = 4
    ndf = 8
    N, H, W = 2, 16, 16

    key = jax.random.PRNGKey(0)
    kx, kl, kp = jax.random.split(key, 3)
    x = jax.random.normal(kx, (N, 2, H, W), dtype=jnp.float32)
    label = jax.random.normal(kl, (N, 2, H, W), dtype=jnp.float32)
    params = init_params(kp, num_classes, ndf)

    fwd = jax.jit(discriminator_fcn_forward)
    out = jax.block_until_ready(fwd(params, x, label))

    # expected output spatial: 16 -> 8 -> 4 -> 2 -> 1 -> (deconv) 2 -> (cls) 2
    assert out.shape == (N, 1, 2, 2), out.shape
    assert out.dtype == jnp.float32, out.dtype
    assert bool(jnp.all(jnp.isfinite(out))), "non-finite output"
    print("KERNEL_OK")
</pallas_src>

<mosaic_0001>
module attributes {stable_mosaic.version = 11 : i64} {
  func.func @_gemm_bias_act_kernel(%arg0: i32, %arg1: i32, %arg2: i32, %arg3: memref<128x128xbf16, #tpu.memory_space<vmem>>, %arg4: memref<128x128xbf16, #tpu.memory_space<vmem>>, %arg5: memref<1x128xf32, #tpu.memory_space<vmem>>, %arg6: memref<128x128xbf16, #tpu.memory_space<vmem>>, %arg7: memref<128x128xf32, #tpu.memory_space<vmem>>) attributes {dimension_semantics = [#tpu.dimension_semantics<parallel>, #tpu.dimension_semantics<parallel>, #tpu.dimension_semantics<arbitrary>], iteration_bounds = array<i64: 1, 1, 1>, scalar_prefetch = 0 : i64, scratch_operands = 1 : i64, tpu.core_type = #tpu.core_type<tc>, window_params = [{transform_indices = @transform_0, window_bounds = array<i64: 128, 128>}, {transform_indices = @transform_1, window_bounds = array<i64: 128, 128>}, {transform_indices = @transform_2, window_bounds = array<i64: 1, 128>}, {transform_indices = @transform_3, window_bounds = array<i64: 128, 128>}]} {
    %c0_i32 = arith.constant 0 : i32
    %0 = arith.cmpi eq, %arg2, %c0_i32 : i32
    %1 = arith.extui %0 : i1 to i32
    %c0_i32_0 = arith.constant 0 : i32
    %2 = arith.cmpi ne, %1, %c0_i32_0 : i32
    scf.if %2 {
      %cst_10 = arith.constant 0.000000e+00 : f32
      %12 = vector.broadcast %cst_10 : f32 to vector<128x128xf32>
      %c0_11 = arith.constant 0 : index
      %c0_12 = arith.constant 0 : index
      %13 = vector.load %arg7[%c0_11, %c0_12] : memref<128x128xf32, #tpu.memory_space<vmem>>, vector<128x128xf32>
      tpu.vector_store %arg7[%c0_11, %c0_12], %12 {strides = array<i32>} : memref<128x128xf32, #tpu.memory_space<vmem>>, vector<128x128xf32>,
    } else {
    }
    %c0 = arith.constant 0 : index
    %c0_1 = arith.constant 0 : index
    %3 = vector.load %arg7[%c0, %c0_1] : memref<128x128xf32, #tpu.memory_space<vmem>>, vector<128x128xf32>
    %c0_2 = arith.constant 0 : index
    %c0_3 = arith.constant 0 : index
    %4 = vector.load %arg3[%c0_2, %c0_3] : memref<128x128xbf16, #tpu.memory_space<vmem>>, vector<128x128xbf16>
    %c0_4 = arith.constant 0 : index
    %c0_5 = arith.constant 0 : index
    %5 = vector.load %arg4[%c0_4, %c0_5] : memref<128x128xbf16, #tpu.memory_space<vmem>>, vector<128x128xbf16>
    %cst = arith.constant dense<0.000000e+00> : vector<128x128xf32>
    %6 = tpu.matmul %4, %5, %cst {dimension_numbers = #tpu.dot_dimension_numbers<[1], [0], [0], [1], [0, 0, 1, 1], [], []>} : vector<128x128xbf16>, vector<128x128xbf16>, vector<128x128xf32> -> vector<128x128xf32>
    %7 = arith.addf %3, %6 : vector<128x128xf32>
    %c0_6 = arith.constant 0 : index
    %c0_7 = arith.constant 0 : index
    %8 = vector.load %arg7[%c0_6, %c0_7] : memref<128x128xf32, #tpu.memory_space<vmem>>, vector<128x128xf32>
    tpu.vector_store %arg7[%c0_6, %c0_7], %7 {strides = array<i32>} : memref<128x128xf32, #tpu.memory_space<vmem>>, vector<128x128xf32>,
    %c0_i32_8 = arith.constant 0 : i32
    %9 = arith.cmpi eq, %arg2, %c0_i32_8 : i32
    %10 = arith.extui %9 : i1 to i32
    %c0_i32_9 = arith.constant 0 : i32
    %11 = arith.cmpi ne, %10, %c0_i32_9 : i32
    scf.if %11 {
      %c0_10 = arith.constant 0 : index
      %c0_11 = arith.constant 0 : index
      %12 = vector.load %arg7[%c0_10, %c0_11] : memref<128x128xf32, #tpu.memory_space<vmem>>, vector<128x128xf32>
      %c0_12 = arith.constant 0 : index
      %c0_13 = arith.constant 0 : index
      %13 = vector.load %arg5[%c0_12, %c0_13] : memref<1x128xf32, #tpu.memory_space<vmem>>, vector<1x128xf32>
      %14 = vector.broadcast %13 : vector<1x128xf32> to vector<128x128xf32>
      %15 = arith.addf %12, %14 : vector<128x128xf32>
      %cst_14 = arith.constant 0.000000e+00 : f32
      %16 = vector.broadcast %cst_14 : f32 to vector<128x128xf32>
      %17 = arith.cmpf oge, %15, %16 : vector<128x128xf32>
      %cst_15 = arith.constant 2.000000e-01 : f32
      %18 = vector.broadcast %cst_15 : f32 to vector<128x128xf32>
      %19 = arith.mulf %18, %15 : vector<128x128xf32>
      %20 = arith.select %17, %15, %19 : vector<128x128xi1>, vector<128x128xf32>
      %21 = arith.truncf %20 : vector<128x128xf32> to vector<128x128xbf16>
      %c0_16 = arith.constant 0 : index
      %c0_17 = arith.constant 0 : index
      %22 = vector.load %arg6[%c0_16, %c0_17] : memref<128x128xbf16, #tpu.memory_space<vmem>>, vector<128x128xbf16>
      tpu.vector_store %arg6[%c0_16, %c0_17], %21 {strides = array<i32>} : memref<128x128xbf16, #tpu.memory_space<vmem>>, vector<128x128xbf16>,
    } else {
    }
    return
  }
  func.func @transform_0(%arg0: i32, %arg1: i32, %arg2: i32) -> (i32, i32) {
    %c0_i32 = arith.constant 0 : i32
    return %arg0, %arg2 : i32, i32
  }
  func.func @transform_1(%arg0: i32, %arg1: i32, %arg2: i32) -> (i32, i32) {
    %c0_i32 = arith.constant 0 : i32
    return %arg2, %arg1 : i32, i32
  }
  func.func @transform_2(%arg0: i32, %arg1: i32, %arg2: i32) -> (i32, i32) {
    %c0_i32 = arith.constant 0 : i32
    %c0_i32_0 = arith.constant 0 : i32
    return %c0_i32, %arg1 : i32, i32
  }
  func.func @transform_3(%arg0: i32, %arg1: i32, %arg2: i32) -> (i32, i32) {
    %c0_i32 = arith.constant 0 : i32
    return %arg0, %arg1 : i32, i32
  }
}

module attributes {stable_mosaic.version = 11 : i64} {
  func.func @_gemm_bias_act_kernel(%arg0: i32, %arg1: i32, %arg2: i32, %arg3: memref<32x128xbf16, #tpu.memory_space<vmem>>, %arg4: memref<128x128xbf16, #tpu.memory_space<vmem>>, %arg5: memref<1x128xf32, #tpu.memory_space<vmem>>, %arg6: memref<32x128xbf16, #tpu.memory_space<vmem>>, %arg7: memref<32x128xf32, #tpu.memory_space<vmem>>) attributes {dimension_semantics = [#tpu.dimension_semantics<parallel>, #tpu.dimension_semantics<parallel>, #tpu.dimension_semantics<arbitrary>], iteration_bounds = array<i64: 1, 1, 1>, scalar_prefetch = 0 : i64, scratch_operands = 1 : i64, tpu.core_type = #tpu.core_type<tc>, window_params = [{transform_indices = @transform_0, window_bounds = array<i64: 32, 128>}, {transform_indices = @transform_1, window_bounds = array<i64: 128, 128>}, {transform_indices = @transform_2, window_bounds = array<i64: 1, 128>}, {transform_indices = @transform_3, window_bounds = array<i64: 32, 128>}]} {
    %c0_i32 = arith.constant 0 : i32
    %0 = arith.cmpi eq, %arg2, %c0_i32 : i32
    %1 = arith.extui %0 : i1 to i32
    %c0_i32_0 = arith.constant 0 : i32
    %2 = arith.cmpi ne, %1, %c0_i32_0 : i32
    scf.if %2 {
      %cst_10 = arith.constant 0.000000e+00 : f32
      %12 = vector.broadcast %cst_10 : f32 to vector<32x128xf32>
      %c0_11 = arith.constant 0 : index
      %c0_12 = arith.constant 0 : index
      %13 = vector.load %arg7[%c0_11, %c0_12] : memref<32x128xf32, #tpu.memory_space<vmem>>, vector<32x128xf32>
      tpu.vector_store %arg7[%c0_11, %c0_12], %12 {strides = array<i32>} : memref<32x128xf32, #tpu.memory_space<vmem>>, vector<32x128xf32>,
    } else {
    }
    %c0 = arith.constant 0 : index
    %c0_1 = arith.constant 0 : index
    %3 = vector.load %arg7[%c0, %c0_1] : memref<32x128xf32, #tpu.memory_space<vmem>>, vector<32x128xf32>
    %c0_2 = arith.constant 0 : index
    %c0_3 = arith.constant 0 : index
    %4 = vector.load %arg3[%c0_2, %c0_3] : memref<32x128xbf16, #tpu.memory_space<vmem>>, vector<32x128xbf16>
    %c0_4 = arith.constant 0 : index
    %c0_5 = arith.constant 0 : index
    %5 = vector.load %arg4[%c0_4, %c0_5] : memref<128x128xbf16, #tpu.memory_space<vmem>>, vector<128x128xbf16>
    %cst = arith.constant dense<0.000000e+00> : vector<32x128xf32>
    %6 = tpu.matmul %4, %5, %cst {dimension_numbers = #tpu.dot_dimension_numbers<[1], [0], [0], [1], [0, 0, 1, 1], [], []>} : vector<32x128xbf16>, vector<128x128xbf16>, vector<32x128xf32> -> vector<32x128xf32>
    %7 = arith.addf %3, %6 : vector<32x128xf32>
    %c0_6 = arith.constant 0 : index
    %c0_7 = arith.constant 0 : index
    %8 = vector.load %arg7[%c0_6, %c0_7] : memref<32x128xf32, #tpu.memory_space<vmem>>, vector<32x128xf32>
    tpu.vector_store %arg7[%c0_6, %c0_7], %7 {strides = array<i32>} : memref<32x128xf32, #tpu.memory_space<vmem>>, vector<32x128xf32>,
    %c0_i32_8 = arith.constant 0 : i32
    %9 = arith.cmpi eq, %arg2, %c0_i32_8 : i32
    %10 = arith.extui %9 : i1 to i32
    %c0_i32_9 = arith.constant 0 : i32
    %11 = arith.cmpi ne, %10, %c0_i32_9 : i32
    scf.if %11 {
      %c0_10 = arith.constant 0 : index
      %c0_11 = arith.constant 0 : index
      %12 = vector.load %arg7[%c0_10, %c0_11] : memref<32x128xf32, #tpu.memory_space<vmem>>, vector<32x128xf32>
      %c0_12 = arith.constant 0 : index
      %c0_13 = arith.constant 0 : index
      %13 = vector.load %arg5[%c0_12, %c0_13] : memref<1x128xf32, #tpu.memory_space<vmem>>, vector<1x128xf32>
      %14 = vector.broadcast %13 : vector<1x128xf32> to vector<32x128xf32>
      %15 = arith.addf %12, %14 : vector<32x128xf32>
      %cst_14 = arith.constant 0.000000e+00 : f32
      %16 = vector.broadcast %cst_14 : f32 to vector<32x128xf32>
      %17 = arith.cmpf oge, %15, %16 : vector<32x128xf32>
      %cst_15 = arith.constant 2.000000e-01 : f32
      %18 = vector.broadcast %cst_15 : f32 to vector<32x128xf32>
      %19 = arith.mulf %18, %15 : vector<32x128xf32>
      %20 = arith.select %17, %15, %19 : vector<32x128xi1>, vector<32x128xf32>
      %21 = arith.truncf %20 : vector<32x128xf32> to vector<32x128xbf16>
      %c0_16 = arith.constant 0 : index
      %c0_17 = arith.constant 0 : index
      %22 = vector.load %arg6[%c0_16, %c0_17] : memref<32x128xbf16, #tpu.memory_space<vmem>>, vector<32x128xbf16>
      tpu.vector_store %arg6[%c0_16, %c0_17], %21 {strides = array<i32>} : memref<32x128xbf16, #tpu.memory_space<vmem>>, vector<32x128xbf16>,
    } else {
    }
    return
  }
  func.func @transform_0(%arg0: i32, %arg1: i32, %arg2: i32) -> (i32, i32) {
    %c0_i32 = arith.constant 0 : i32
    return %arg0, %arg2 : i32, i32
  }
  func.func @transform_1(%arg0: i32, %arg1: i32, %arg2: i32) -> (i32, i32) {
    %c0_i32 = arith.constant 0 : i32
    return %arg2, %arg1 : i32, i32
  }
  func.func @transform_2(%arg0: i32, %arg1: i32, %arg2: i32) -> (i32, i32) {
    %c0_i32 = arith.constant 0 : i32
    %c0_i32_0 = arith.constant 0 : i32
    return %c0_i32, %arg1 : i32, i32
  }
  func.func @transform_3(%arg0: i32, %arg1: i32, %arg2: i32) -> (i32, i32) {
    %c0_i32 = arith.constant 0 : i32
    return %arg0, %arg1 : i32, i32
  }
}

module attributes {stable_mosaic.version = 11 : i64} {
  func.func @_gemm_bias_act_kernel(%arg0: i32, %arg1: i32, %arg2: i32, %arg3: memref<8x256xbf16, #tpu.memory_space<vmem>>, %arg4: memref<256x128xbf16, #tpu.memory_space<vmem>>, %arg5: memref<1x128xf32, #tpu.memory_space<vmem>>, %arg6: memref<8x128xbf16, #tpu.memory_space<vmem>>, %arg7: memref<8x128xf32, #tpu.memory_space<vmem>>) attributes {dimension_semantics = [#tpu.dimension_semantics<parallel>, #tpu.dimension_semantics<parallel>, #tpu.dimension_semantics<arbitrary>], iteration_bounds = array<i64: 1, 1, 1>, scalar_prefetch = 0 : i64, scratch_operands = 1 : i64, tpu.core_type = #tpu.core_type<tc>, window_params = [{transform_indices = @transform_0, window_bounds = array<i64: 8, 256>}, {transform_indices = @transform_1, window_bounds = array<i64: 256, 128>}, {transform_indices = @transform_2, window_bounds = array<i64: 1, 128>}, {transform_indices = @transform_3, window_bounds = array<i64: 8, 128>}]} {
    %c0_i32 = arith.constant 0 : i32
    %0 = arith.cmpi eq, %arg2, %c0_i32 : i32
    %1 = arith.extui %0 : i1 to i32
    %c0_i32_0 = arith.constant 0 : i32
    %2 = arith.cmpi ne, %1, %c0_i32_0 : i32
    scf.if %2 {
      %cst_10 = arith.constant 0.000000e+00 : f32
      %12 = vector.broadcast %cst_10 : f32 to vector<8x128xf32>
      %c0_11 = arith.constant 0 : index
      %c0_12 = arith.constant 0 : index
      %13 = vector.load %arg7[%c0_11, %c0_12] : memref<8x128xf32, #tpu.memory_space<vmem>>, vector<8x128xf32>
      tpu.vector_store %arg7[%c0_11, %c0_12], %12 {strides = array<i32>} : memref<8x128xf32, #tpu.memory_space<vmem>>, vector<8x128xf32>,
    } else {
    }
    %c0 = arith.constant 0 : index
    %c0_1 = arith.constant 0 : index
    %3 = vector.load %arg7[%c0, %c0_1] : memref<8x128xf32, #tpu.memory_space<vmem>>, vector<8x128xf32>
    %c0_2 = arith.constant 0 : index
    %c0_3 = arith.constant 0 : index
    %4 = vector.load %arg3[%c0_2, %c0_3] : memref<8x256xbf16, #tpu.memory_space<vmem>>, vector<8x256xbf16>
    %c0_4 = arith.constant 0 : index
    %c0_5 = arith.constant 0 : index
    %5 = vector.load %arg4[%c0_4, %c0_5] : memref<256x128xbf16, #tpu.memory_space<vmem>>, vector<256x128xbf16>
    %cst = arith.constant dense<0.000000e+00> : vector<8x128xf32>
    %6 = tpu.matmul %4, %5, %cst {dimension_numbers = #tpu.dot_dimension_numbers<[1], [0], [0], [1], [0, 0, 1, 1], [], []>} : vector<8x256xbf16>, vector<256x128xbf16>, vector<8x128xf32> -> vector<8x128xf32>
    %7 = arith.addf %3, %6 : vector<8x128xf32>
    %c0_6 = arith.constant 0 : index
    %c0_7 = arith.constant 0 : index
    %8 = vector.load %arg7[%c0_6, %c0_7] : memref<8x128xf32, #tpu.memory_space<vmem>>, vector<8x128xf32>
    tpu.vector_store %arg7[%c0_6, %c0_7], %7 {strides = array<i32>} : memref<8x128xf32, #tpu.memory_space<vmem>>, vector<8x128xf32>,
    %c0_i32_8 = arith.constant 0 : i32
    %9 = arith.cmpi eq, %arg2, %c0_i32_8 : i32
    %10 = arith.extui %9 : i1 to i32
    %c0_i32_9 = arith.constant 0 : i32
    %11 = arith.cmpi ne, %10, %c0_i32_9 : i32
    scf.if %11 {
      %c0_10 = arith.constant 0 : index
      %c0_11 = arith.constant 0 : index
      %12 = vector.load %arg7[%c0_10, %c0_11] : memref<8x128xf32, #tpu.memory_space<vmem>>, vector<8x128xf32>
      %c0_12 = arith.constant 0 : index
      %c0_13 = arith.constant 0 : index
      %13 = vector.load %arg5[%c0_12, %c0_13] : memref<1x128xf32, #tpu.memory_space<vmem>>, vector<1x128xf32>
      %14 = vector.broadcast %13 : vector<1x128xf32> to vector<8x128xf32>
      %15 = arith.addf %12, %14 : vector<8x128xf32>
      %cst_14 = arith.constant 0.000000e+00 : f32
      %16 = vector.broadcast %cst_14 : f32 to vector<8x128xf32>
      %17 = arith.cmpf oge, %15, %16 : vector<8x128xf32>
      %cst_15 = arith.constant 2.000000e-01 : f32
      %18 = vector.broadcast %cst_15 : f32 to vector<8x128xf32>
      %19 = arith.mulf %18, %15 : vector<8x128xf32>
      %20 = arith.select %17, %15, %19 : vector<8x128xi1>, vector<8x128xf32>
      %21 = arith.truncf %20 : vector<8x128xf32> to vector<8x128xbf16>
      %c0_16 = arith.constant 0 : index
      %c0_17 = arith.constant 0 : index
      %22 = vector.load %arg6[%c0_16, %c0_17] : memref<8x128xbf16, #tpu.memory_space<vmem>>, vector<8x128xbf16>
      tpu.vector_store %arg6[%c0_16, %c0_17], %21 {strides = array<i32>} : memref<8x128xbf16, #tpu.memory_space<vmem>>, vector<8x128xbf16>,
    } else {
    }
    return
  }
  func.func @transform_0(%arg0: i32, %arg1: i32, %arg2: i32) -> (i32, i32) {
    %c0_i32 = arith.constant 0 : i32
    return %arg0, %arg2 : i32, i32
  }
  func.func @transform_1(%arg0: i32, %arg1: i32, %arg2: i32) -> (i32, i32) {
    %c0_i32 = arith.constant 0 : i32
    return %arg2, %arg1 : i32, i32
  }
  func.func @transform_2(%arg0: i32, %arg1: i32, %arg2: i32) -> (i32, i32) {
    %c0_i32 = arith.constant 0 : i32
    %c0_i32_0 = arith.constant 0 : i32
    return %c0_i32, %arg1 : i32, i32
  }
  func.func @transform_3(%arg0: i32, %arg1: i32, %arg2: i32) -> (i32, i32) {
    %c0_i32 = arith.constant 0 : i32
    return %arg0, %arg1 : i32, i32
  }
}

module attributes {stable_mosaic.version = 11 : i64} {
  func.func @_gemm_bias_act_kernel(%arg0: i32, %arg1: i32, %arg2: i32, %arg3: memref<8x256xbf16, #tpu.memory_space<vmem>>, %arg4: memref<256x128xbf16, #tpu.memory_space<vmem>>, %arg5: memref<1x128xf32, #tpu.memory_space<vmem>>, %arg6: memref<8x128xbf16, #tpu.memory_space<vmem>>, %arg7: memref<8x128xf32, #tpu.memory_space<vmem>>) attributes {dimension_semantics = [#tpu.dimension_semantics<parallel>, #tpu.dimension_semantics<parallel>, #tpu.dimension_semantics<arbitrary>], iteration_bounds = array<i64: 1, 1, 2>, scalar_prefetch = 0 : i64, scratch_operands = 1 : i64, tpu.core_type = #tpu.core_type<tc>, window_params = [{transform_indices = @transform_0, window_bounds = array<i64: 8, 256>}, {transform_indices = @transform_1, window_bounds = array<i64: 256, 128>}, {transform_indices = @transform_2, window_bounds = array<i64: 1, 128>}, {transform_indices = @transform_3, window_bounds = array<i64: 8, 128>}]} {
    %c0_i32 = arith.constant 0 : i32
    %0 = arith.cmpi eq, %arg2, %c0_i32 : i32
    %1 = arith.extui %0 : i1 to i32
    %c0_i32_0 = arith.constant 0 : i32
    %2 = arith.cmpi ne, %1, %c0_i32_0 : i32
    scf.if %2 {
      %cst_9 = arith.constant 0.000000e+00 : f32
      %12 = vector.broadcast %cst_9 : f32 to vector<8x128xf32>
      %c0_10 = arith.constant 0 : index
      %c0_11 = arith.constant 0 : index
      %13 = vector.load %arg7[%c0_10, %c0_11] : memref<8x128xf32, #tpu.memory_space<vmem>>, vector<8x128xf32>
      tpu.vector_store %arg7[%c0_10, %c0_11], %12 {strides = array<i32>} : memref<8x128xf32, #tpu.memory_space<vmem>>, vector<8x128xf32>,
    } else {
    }
    %c0 = arith.constant 0 : index
    %c0_1 = arith.constant 0 : index
    %3 = vector.load %arg7[%c0, %c0_1] : memref<8x128xf32, #tpu.memory_space<vmem>>, vector<8x128xf32>
    %c0_2 = arith.constant 0 : index
    %c0_3 = arith.constant 0 : index
    %4 = vector.load %arg3[%c0_2, %c0_3] : memref<8x256xbf16, #tpu.memory_space<vmem>>, vector<8x256xbf16>
    %c0_4 = arith.constant 0 : index
    %c0_5 = arith.constant 0 : index
    %5 = vector.load %arg4[%c0_4, %c0_5] : memref<256x128xbf16, #tpu.memory_space<vmem>>, vector<256x128xbf16>
    %cst = arith.constant dense<0.000000e+00> : vector<8x128xf32>
    %6 = tpu.matmul %4, %5, %cst {dimension_numbers = #tpu.dot_dimension_numbers<[1], [0], [0], [1], [0, 0, 1, 1], [], []>} : vector<8x256xbf16>, vector<256x128xbf16>, vector<8x128xf32> -> vector<8x128xf32>
    %7 = arith.addf %3, %6 : vector<8x128xf32>
    %c0_6 = arith.constant 0 : index
    %c0_7 = arith.constant 0 : index
    %8 = vector.load %arg7[%c0_6, %c0_7] : memref<8x128xf32, #tpu.memory_space<vmem>>, vector<8x128xf32>
    tpu.vector_store %arg7[%c0_6, %c0_7], %7 {strides = array<i32>} : memref<8x128xf32, #tpu.memory_space<vmem>>, vector<8x128xf32>,
    %c1_i32 = arith.constant 1 : i32
    %9 = arith.cmpi eq, %arg2, %c1_i32 : i32
    %10 = arith.extui %9 : i1 to i32
    %c0_i32_8 = arith.constant 0 : i32
    %11 = arith.cmpi ne, %10, %c0_i32_8 : i32
    scf.if %11 {
      %c0_9 = arith.constant 0 : index
      %c0_10 = arith.constant 0 : index
      %12 = vector.load %arg7[%c0_9, %c0_10] : memref<8x128xf32, #tpu.memory_space<vmem>>, vector<8x128xf32>
      %c0_11 = arith.constant 0 : index
      %c0_12 = arith.constant 0 : index
      %13 = vector.load %arg5[%c0_11, %c0_12] : memref<1x128xf32, #tpu.memory_space<vmem>>, vector<1x128xf32>
      %14 = vector.broadcast %13 : vector<1x128xf32> to vector<8x128xf32>
      %15 = arith.addf %12, %14 : vector<8x128xf32>
      %cst_13 = arith.constant 0.000000e+00 : f32
      %16 = vector.broadcast %cst_13 : f32 to vector<8x128xf32>
      %17 = arith.cmpf oge, %15, %16 : vector<8x128xf32>
      %cst_14 = arith.constant 2.000000e-01 : f32
      %18 = vector.broadcast %cst_14 : f32 to vector<8x128xf32>
      %19 = arith.mulf %18, %15 : vector<8x128xf32>
      %20 = arith.select %17, %15, %19 : vector<8x128xi1>, vector<8x128xf32>
      %21 = arith.truncf %20 : vector<8x128xf32> to vector<8x128xbf16>
      %c0_15 = arith.constant 0 : index
      %c0_16 = arith.constant 0 : index
      %22 = vector.load %arg6[%c0_15, %c0_16] : memref<8x128xbf16, #tpu.memory_space<vmem>>, vector<8x128xbf16>
      tpu.vector_store %arg6[%c0_15, %c0_16], %21 {strides = array<i32>} : memref<8x128xbf16, #tpu.memory_space<vmem>>, vector<8x128xbf16>,
    } else {
    }
    return
  }
  func.func @transform_0(%arg0: i32, %arg1: i32, %arg2: i32) -> (i32, i32) {
    %c0_i32 = arith.constant 0 : i32
    return %arg0, %arg2 : i32, i32
  }
  func.func @transform_1(%arg0: i32, %arg1: i32, %arg2: i32) -> (i32, i32) {
    %c0_i32 = arith.constant 0 : i32
    return %arg2, %arg1 : i32, i32
  }
  func.func @transform_2(%arg0: i32, %arg1: i32, %arg2: i32) -> (i32, i32) {
    %c0_i32 = arith.constant 0 : i32
    %c0_i32_0 = arith.constant 0 : i32
    return %c0_i32, %arg1 : i32, i32
  }
  func.func @transform_3(%arg0: i32, %arg1: i32, %arg2: i32) -> (i32, i32) {
    %c0_i32 = arith.constant 0 : i32
    return %arg0, %arg1 : i32, i32
  }
}

module attributes {stable_mosaic.version = 11 : i64} {
  func.func @_gemm_bias_act_kernel(%arg0: i32, %arg1: i32, %arg2: i32, %arg3: memref<8x256xbf16, #tpu.memory_space<vmem>>, %arg4: memref<256x128xbf16, #tpu.memory_space<vmem>>, %arg5: memref<1x128xf32, #tpu.memory_space<vmem>>, %arg6: memref<8x128xbf16, #tpu.memory_space<vmem>>, %arg7: memref<8x128xf32, #tpu.memory_space<vmem>>) attributes {dimension_semantics = [#tpu.dimension_semantics<parallel>, #tpu.dimension_semantics<parallel>, #tpu.dimension_semantics<arbitrary>], iteration_bounds = array<i64: 1, 1, 4>, scalar_prefetch = 0 : i64, scratch_operands = 1 : i64, tpu.core_type = #tpu.core_type<tc>, window_params = [{transform_indices = @transform_0, window_bounds = array<i64: 8, 256>}, {transform_indices = @transform_1, window_bounds = array<i64: 256, 128>}, {transform_indices = @transform_2, window_bounds = array<i64: 1, 128>}, {transform_indices = @transform_3, window_bounds = array<i64: 8, 128>}]} {
    %c0_i32 = arith.constant 0 : i32
    %0 = arith.cmpi eq, %arg2, %c0_i32 : i32
    %1 = arith.extui %0 : i1 to i32
    %c0_i32_0 = arith.constant 0 : i32
    %2 = arith.cmpi ne, %1, %c0_i32_0 : i32
    scf.if %2 {
      %cst_9 = arith.constant 0.000000e+00 : f32
      %12 = vector.broadcast %cst_9 : f32 to vector<8x128xf32>
      %c0_10 = arith.constant 0 : index
      %c0_11 = arith.constant 0 : index
      %13 = vector.load %arg7[%c0_10, %c0_11] : memref<8x128xf32, #tpu.memory_space<vmem>>, vector<8x128xf32>
      tpu.vector_store %arg7[%c0_10, %c0_11], %12 {strides = array<i32>} : memref<8x128xf32, #tpu.memory_space<vmem>>, vector<8x128xf32>,
    } else {
    }
    %c0 = arith.constant 0 : index
    %c0_1 = arith.constant 0 : index
    %3 = vector.load %arg7[%c0, %c0_1] : memref<8x128xf32, #tpu.memory_space<vmem>>, vector<8x128xf32>
    %c0_2 = arith.constant 0 : index
    %c0_3 = arith.constant 0 : index
    %4 = vector.load %arg3[%c0_2, %c0_3] : memref<8x256xbf16, #tpu.memory_space<vmem>>, vector<8x256xbf16>
    %c0_4 = arith.constant 0 : index
    %c0_5 = arith.constant 0 : index
    %5 = vector.load %arg4[%c0_4, %c0_5] : memref<256x128xbf16, #tpu.memory_space<vmem>>, vector<256x128xbf16>
    %cst = arith.constant dense<0.000000e+00> : vector<8x128xf32>
    %6 = tpu.matmul %4, %5, %cst {dimension_numbers = #tpu.dot_dimension_numbers<[1], [0], [0], [1], [0, 0, 1, 1], [], []>} : vector<8x256xbf16>, vector<256x128xbf16>, vector<8x128xf32> -> vector<8x128xf32>
    %7 = arith.addf %3, %6 : vector<8x128xf32>
    %c0_6 = arith.constant 0 : index
    %c0_7 = arith.constant 0 : index
    %8 = vector.load %arg7[%c0_6, %c0_7] : memref<8x128xf32, #tpu.memory_space<vmem>>, vector<8x128xf32>
    tpu.vector_store %arg7[%c0_6, %c0_7], %7 {strides = array<i32>} : memref<8x128xf32, #tpu.memory_space<vmem>>, vector<8x128xf32>,
    %c3_i32 = arith.constant 3 : i32
    %9 = arith.cmpi eq, %arg2, %c3_i32 : i32
    %10 = arith.extui %9 : i1 to i32
    %c0_i32_8 = arith.constant 0 : i32
    %11 = arith.cmpi ne, %10, %c0_i32_8 : i32
    scf.if %11 {
      %c0_9 = arith.constant 0 : index
      %c0_10 = arith.constant 0 : index
      %12 = vector.load %arg7[%c0_9, %c0_10] : memref<8x128xf32, #tpu.memory_space<vmem>>, vector<8x128xf32>
      %c0_11 = arith.constant 0 : index
      %c0_12 = arith.constant 0 : index
      %13 = vector.load %arg5[%c0_11, %c0_12] : memref<1x128xf32, #tpu.memory_space<vmem>>, vector<1x128xf32>
      %14 = vector.broadcast %13 : vector<1x128xf32> to vector<8x128xf32>
      %15 = arith.addf %12, %14 : vector<8x128xf32>
      %cst_13 = arith.constant 0.000000e+00 : f32
      %16 = vector.broadcast %cst_13 : f32 to vector<8x128xf32>
      %17 = arith.cmpf oge, %15, %16 : vector<8x128xf32>
      %cst_14 = arith.constant 2.000000e-01 : f32
      %18 = vector.broadcast %cst_14 : f32 to vector<8x128xf32>
      %19 = arith.mulf %18, %15 : vector<8x128xf32>
      %20 = arith.select %17, %15, %19 : vector<8x128xi1>, vector<8x128xf32>
      %21 = arith.truncf %20 : vector<8x128xf32> to vector<8x128xbf16>
      %c0_15 = arith.constant 0 : index
      %c0_16 = arith.constant 0 : index
      %22 = vector.load %arg6[%c0_15, %c0_16] : memref<8x128xbf16, #tpu.memory_space<vmem>>, vector<8x128xbf16>
      tpu.vector_store %arg6[%c0_15, %c0_16], %21 {strides = array<i32>} : memref<8x128xbf16, #tpu.memory_space<vmem>>, vector<8x128xbf16>,
    } else {
    }
    return
  }
  func.func @transform_0(%arg0: i32, %arg1: i32, %arg2: i32) -> (i32, i32) {
    %c0_i32 = arith.constant 0 : i32
    return %arg0, %arg2 : i32, i32
  }
  func.func @transform_1(%arg0: i32, %arg1: i32, %arg2: i32) -> (i32, i32) {
    %c0_i32 = arith.constant 0 : i32
    return %arg2, %arg1 : i32, i32
  }
  func.func @transform_2(%arg0: i32, %arg1: i32, %arg2: i32) -> (i32, i32) {
    %c0_i32 = arith.constant 0 : i32
    %c0_i32_0 = arith.constant 0 : i32
    return %c0_i32, %arg1 : i32, i32
  }
  func.func @transform_3(%arg0: i32, %arg1: i32, %arg2: i32) -> (i32, i32) {
    %c0_i32 = arith.constant 0 : i32
    return %arg0, %arg1 : i32, i32
  }
}

module attributes {stable_mosaic.version = 11 : i64} {
  func.func @_gemm_bias_act_kernel(%arg0: i32, %arg1: i32, %arg2: i32, %arg3: memref<8x256xbf16, #tpu.memory_space<vmem>>, %arg4: memref<256x128xbf16, #tpu.memory_space<vmem>>, %arg5: memref<1x128xf32, #tpu.memory_space<vmem>>, %arg6: memref<8x128xf32, #tpu.memory_space<vmem>>, %arg7: memref<8x128xf32, #tpu.memory_space<vmem>>) attributes {dimension_semantics = [#tpu.dimension_semantics<parallel>, #tpu.dimension_semantics<parallel>, #tpu.dimension_semantics<arbitrary>], iteration_bounds = array<i64: 1, 1, 2>, scalar_prefetch = 0 : i64, scratch_operands = 1 : i64, tpu.core_type = #tpu.core_type<tc>, window_params = [{transform_indices = @transform_0, window_bounds = array<i64: 8, 256>}, {transform_indices = @transform_1, window_bounds = array<i64: 256, 128>}, {transform_indices = @transform_2, window_bounds = array<i64: 1, 128>}, {transform_indices = @transform_3, window_bounds = array<i64: 8, 128>}]} {
    %c0_i32 = arith.constant 0 : i32
    %0 = arith.cmpi eq, %arg2, %c0_i32 : i32
    %1 = arith.extui %0 : i1 to i32
    %c0_i32_0 = arith.constant 0 : i32
    %2 = arith.cmpi ne, %1, %c0_i32_0 : i32
    scf.if %2 {
      %cst_9 = arith.constant 0.000000e+00 : f32
      %12 = vector.broadcast %cst_9 : f32 to vector<8x128xf32>
      %c0_10 = arith.constant 0 : index
      %c0_11 = arith.constant 0 : index
      %13 = vector.load %arg7[%c0_10, %c0_11] : memref<8x128xf32, #tpu.memory_space<vmem>>, vector<8x128xf32>
      tpu.vector_store %arg7[%c0_10, %c0_11], %12 {strides = array<i32>} : memref<8x128xf32, #tpu.memory_space<vmem>>, vector<8x128xf32>,
    } else {
    }
    %c0 = arith.constant 0 : index
    %c0_1 = arith.constant 0 : index
    %3 = vector.load %arg7[%c0, %c0_1] : memref<8x128xf32, #tpu.memory_space<vmem>>, vector<8x128xf32>
    %c0_2 = arith.constant 0 : index
    %c0_3 = arith.constant 0 : index
    %4 = vector.load %arg3[%c0_2, %c0_3] : memref<8x256xbf16, #tpu.memory_space<vmem>>, vector<8x256xbf16>
    %c0_4 = arith.constant 0 : index
    %c0_5 = arith.constant 0 : index
    %5 = vector.load %arg4[%c0_4, %c0_5] : memref<256x128xbf16, #tpu.memory_space<vmem>>, vector<256x128xbf16>
    %cst = arith.constant dense<0.000000e+00> : vector<8x128xf32>
    %6 = tpu.matmul %4, %5, %cst {dimension_numbers = #tpu.dot_dimension_numbers<[1], [0], [0], [1], [0, 0, 1, 1], [], []>} : vector<8x256xbf16>, vector<256x128xbf16>, vector<8x128xf32> -> vector<8x128xf32>
    %7 = arith.addf %3, %6 : vector<8x128xf32>
    %c0_6 = arith.constant 0 : index
    %c0_7 = arith.constant 0 : index
    %8 = vector.load %arg7[%c0_6, %c0_7] : memref<8x128xf32, #tpu.memory_space<vmem>>, vector<8x128xf32>
    tpu.vector_store %arg7[%c0_6, %c0_7], %7 {strides = array<i32>} : memref<8x128xf32, #tpu.memory_space<vmem>>, vector<8x128xf32>,
    %c1_i32 = arith.constant 1 : i32
    %9 = arith.cmpi eq, %arg2, %c1_i32 : i32
    %10 = arith.extui %9 : i1 to i32
    %c0_i32_8 = arith.constant 0 : i32
    %11 = arith.cmpi ne, %10, %c0_i32_8 : i32
    scf.if %11 {
      %c0_9 = arith.constant 0 : index
      %c0_10 = arith.constant 0 : index
      %12 = vector.load %arg7[%c0_9, %c0_10] : memref<8x128xf32, #tpu.memory_space<vmem>>, vector<8x128xf32>
      %c0_11 = arith.constant 0 : index
      %c0_12 = arith.constant 0 : index
      %13 = vector.load %arg5[%c0_11, %c0_12] : memref<1x128xf32, #tpu.memory_space<vmem>>, vector<1x128xf32>
      %14 = vector.broadcast %13 : vector<1x128xf32> to vector<8x128xf32>
      %15 = arith.addf %12, %14 : vector<8x128xf32>
      %c0_13 = arith.constant 0 : index
      %c0_14 = arith.constant 0 : index
      %16 = vector.load %arg6[%c0_13, %c0_14] : memref<8x128xf32, #tpu.memory_space<vmem>>, vector<8x128xf32>
      tpu.vector_store %arg6[%c0_13, %c0_14], %15 {strides = array<i32>} : memref<8x128xf32, #tpu.memory_space<vmem>>, vector<8x128xf32>,
    } else {
    }
    return
  }
  func.func @transform_0(%arg0: i32, %arg1: i32, %arg2: i32) -> (i32, i32) {
    %c0_i32 = arith.constant 0 : i32
    return %arg0, %arg2 : i32, i32
  }
  func.func @transform_1(%arg0: i32, %arg1: i32, %arg2: i32) -> (i32, i32) {
    %c0_i32 = arith.constant 0 : i32
    return %arg2, %arg1 : i32, i32
  }
  func.func @transform_2(%arg0: i32, %arg1: i32, %arg2: i32) -> (i32, i32) {
    %c0_i32 = arith.constant 0 : i32
    %c0_i32_0 = arith.constant 0 : i32
    return %c0_i32, %arg1 : i32, i32
  }
  func.func @transform_3(%arg0: i32, %arg1: i32, %arg2: i32) -> (i32, i32) {
    %c0_i32 = arith.constant 0 : i32
    return %arg0, %arg1 : i32, i32
  }
}

</mosaic_0001>

<bundles_post_ra>
// kernel: discriminator_fcn_forward.6
= control target key start
LH: loop header
LB: loop body
LE: loop exit
PB: predicated region body
PF: predicated region fallthrough
CT: control target
= control target key end

     0   :  { %s647_s1 = inlined_call_operand.vmem [shape: bf16[128,128], index: 1, kind: input, shape index: {}]   ;;  %s648_s2 = inlined_call_operand.vmem [shape: f32[1,128], index: 2, kind: input, shape index: {}]   ;;  %s649_s0 = inlined_call_operand.vmem [shape: bf16[128,128], index: 0, kind: input, shape index: {}]   ;;  %s650_s3 = inlined_call_operand.vmem [shape: bf16[128,128], index: 3, kind: output, shape index: {}]  }
   0x1   :  { %v461_v0 = vld [vmem:[%s647_s1 + $0x38] sm:$0xff]  ;;  %v460_v1 = vld [vmem:[%s647_s1 + $0x30] sm:$0xff]  ;;  %v459_v2 = vld [vmem:[%s647_s1 + $0x28] sm:$0xff] }
   0x2   :  { %178 = vmatpush.bf16.msra.mxu0 %v461_v0  ;;  %509 = vmatpush.bf16.msra.mxu1 %v461_v0  ;;  %v458_v3 = vld [vmem:[%s647_s1 + $0x20] sm:$0xff]  ;;  %v457_v4 = vld [vmem:[%s647_s1 + $0x18] sm:$0xff]  ;;  %v456_v5 = vld [vmem:[%s647_s1 + $0x10] sm:$0xff] }
   0x3   :  { %510 = vmatpush.bf16.msra.mxu2 %v461_v0  ;;  %511 = vmatpush.bf16.msra.mxu3 %v461_v0  ;;  %v455_v6 = vld [vmem:[%s647_s1 + $0x8] sm:$0xff]  ;;  %v454_v7 = vld [vmem:[%s647_s1] sm:$0xff]  ;;  %v448_v9 = vld [vmem:[%s649_s0 + $0x10] sm:$0xff] }
   0x4   :  { %v446_v8 = vld [vmem:[%s649_s0] sm:$0xff]  ;;  %v452_v11 = vld [vmem:[%s649_s0 + $0x30] sm:$0xff]  ;;  %v447_v12 = vld [vmem:[%s649_s0 + $0x8] sm:$0xff] }
   0x5   :  { %v450_v10 = vld [vmem:[%s649_s0 + $0x20] sm:$0xff]  ;;  %v449_v13 = vld [vmem:[%s649_s0 + $0x18] sm:$0xff]  ;;  %v451_v14 = vld [vmem:[%s649_s0 + $0x28] sm:$0xff] }
   0x6   :  { %179 = vmatpush.bf16.msra.mxu0 %v460_v1  ;;  %512 = vmatpush.bf16.msra.mxu1 %v460_v1  ;;  %v453_v15 = vld [vmem:[%s649_s0 + $0x38] sm:$0xff]  ;;  %v605_v18 = vld [vmem:[%s648_s2] ss:$0 sm:$0xff] }
   0x7   :  { %513 = vmatpush.bf16.msra.mxu2 %v460_v1  ;;  %514 = vmatpush.bf16.msra.mxu3 %v460_v1 }
   0xa   :  { %180 = vmatpush.bf16.msra.mxu0 %v459_v2  ;;  %515 = vmatpush.bf16.msra.mxu1 %v459_v2 }
   0xb   :  { %516 = vmatpush.bf16.msra.mxu2 %v459_v2  ;;  %517 = vmatpush.bf16.msra.mxu3 %v459_v2 }
   0xe   :  { %181 = vmatpush.bf16.msra.mxu0 %v458_v3  ;;  %518 = vmatpush.bf16.msra.mxu1 %v458_v3 }
   0xf   :  { %519 = vmatpush.bf16.msra.mxu2 %v458_v3  ;;  %520 = vmatpush.bf16.msra.mxu3 %v458_v3 }
  0x12   :  { %182 = vmatpush.bf16.msra.mxu0 %v457_v4  ;;  %521 = vmatpush.bf16.msra.mxu1 %v457_v4 }
  0x13   :  { %522 = vmatpush.bf16.msra.mxu2 %v457_v4  ;;  %523 = vmatpush.bf16.msra.mxu3 %v457_v4 }
  0x16   :  { %183 = vmatpush.bf16.msra.mxu0 %v456_v5  ;;  %524 = vmatpush.bf16.msra.mxu1 %v456_v5 }
  0x17   :  { %525 = vmatpush.bf16.msra.mxu2 %v456_v5  ;;  %526 = vmatpush.bf16.msra.mxu3 %v456_v5 }
  0x1a   :  { %184 = vmatpush.bf16.msra.mxu0 %v455_v6  ;;  %527 = vmatpush.bf16.msra.mxu1 %v455_v6 }
  0x1b   :  { %528 = vmatpush.bf16.msra.mxu2 %v455_v6  ;;  %529 = vmatpush.bf16.msra.mxu3 %v455_v6 }
  0x1e   :  { %185 = vmatpush.bf16.msra.mxu0 %v454_v7  ;;  %530 = vmatpush.bf16.msra.mxu1 %v454_v7 }
  0x1f   :  { %531 = vmatpush.bf16.msra.mxu2 %v454_v7  ;;  %532 = vmatpush.bf16.msra.mxu3 %v454_v7 }
  0x21   :  { %186 = vmatmul.bf16.vlgmr.msra.gmra.mxu0 %v446_v8  ;;  %196 = vmatmul.bf16.vlgmr.msra.gmra.mxu1 %v448_v9 }
  0x22   :  { %206 = vmatmul.bf16.vlgmr.msra.gmra.mxu2 %v450_v10  ;;  %216 = vmatmul.bf16.vlgmr.msra.gmra.mxu3 %v452_v11 }
  0x31   :  { %191 = vmatmul.bf16.gmra.mxu0 %v447_v12  ;;  %201 = vmatmul.bf16.gmra.mxu1 %v449_v13 }
  0x32   :  { %211 = vmatmul.bf16.gmra.mxu2 %v451_v14  ;;  %221 = vmatmul.bf16.gmra.mxu3 %v453_v15 }
  0x9e   :  { %v187_v16 = vpop.f32.mrf.mxu0  ;;  %v197_v17 = vpop.f32.mrf.mxu1 }
  0x9f   :  { %v282_v19 = vadd.f32 %v605_v18, %v187_v16  ;;  %v286_v20 = vadd.f32 %v605_v18, %v197_v17 }
  0xa1   :  { %v314_v25 = vmul.f32 0.2, %v282_v19  ;;  %v318_v26 = vmul.f32 0.2, %v286_v20  ;;  %vm298_vm0 = vcmp.ge.f32.partialorder %v282_v19, 0.0  ;;  %vm302_vm1 = vcmp.ge.f32.partialorder %v286_v20, 0.0 }
  0xa3   :  { %v330_v33 = vsel %vm298_vm0, %v282_v19, %v314_v25  ;;  %v334_v34 = vsel %vm302_vm1, %v286_v20, %v318_v26 }
  0xa5   :  { %v207_v21 = vpop.f32.mrf.mxu2  ;;  %v217_v22 = vpop.f32.mrf.mxu3 }
  0xa6   :  { %v189_v23 = vpop.f32.mrf.mxu0  ;;  %v199_v24 = vpop.f32.mrf.mxu1  ;;  %v290_v31 = vadd.f32 %v605_v18, %v207_v21  ;;  %v294_v32 = vadd.f32 %v605_v18, %v217_v22 }
  0xa7   :  { %v283_v27 = vadd.f32 %v605_v18, %v189_v23  ;;  %v287_v28 = vadd.f32 %v605_v18, %v199_v24 }
  0xa8   :  { %v322_v41 = vmul.f32 0.2, %v290_v31  ;;  %v326_v42 = vmul.f32 0.2, %v294_v32  ;;  %vm306_vm4 = vcmp.ge.f32.partialorder %v290_v31, 0.0  ;;  %vm310_vm5 = vcmp.ge.f32.partialorder %v294_v32, 0.0 }
  0xa9   :  { %vm299_vm2 = vcmp.ge.f32.partialorder %v283_v27, 0.0  ;;  %v315_v29 = vmul.f32 0.2, %v283_v27  ;;  %vm303_vm3 = vcmp.ge.f32.partialorder %v287_v28, 0.0  ;;  %v319_v30 = vmul.f32 0.2, %v287_v28 }
  0xaa   :  { %v338_v49 = vsel %vm306_vm4, %v290_v31, %v322_v41  ;;  %v342_v50 = vsel %vm310_vm5, %v294_v32, %v326_v42 }
  0xab   :  { %v331_v35 = vsel %vm299_vm2, %v283_v27, %v315_v29  ;;  %v335_v36 = vsel %vm303_vm3, %v287_v28, %v319_v30 }
  0xac   :  { %v465_v37 = vpack.c.bf16 %v331_v35, %v330_v33  ;;  %v475_v38 = vpack.c.bf16 %v335_v36, %v334_v34 }
  0xad   :  { %v209_v39 = vpop.f32.mrf.mxu2  ;;  %v219_v40 = vpop.f32.mrf.mxu3 }
  0xae   :  { %466 = vst [vmem:[%s650_s3] sm:$0xff] %v465_v37   ;;  %v291_v43 = vadd.f32 %v605_v18, %v209_v39  ;;  %v295_v44 = vadd.f32 %v605_v18, %v219_v40  ;;  %v192_v45 = vpop.f32.mrf.mxu0  ;;  %v202_v46 = vpop.f32.mrf.mxu1 }
  0xaf   :  { %503 = vst [vmem:[%s650_s3 + $0x10] sm:$0xff] %v475_v38   ;;  %v284_v55 = vadd.f32 %v605_v18, %v192_v45  ;;  %v288_v56 = vadd.f32 %v605_v18, %v202_v46 }
  0xb0   :  { %vm307_vm6 = vcmp.ge.f32.partialorder %v291_v43, 0.0  ;;  %v323_v47 = vmul.f32 0.2, %v291_v43  ;;  %vm311_vm7 = vcmp.ge.f32.partialorder %v295_v44, 0.0  ;;  %v327_v48 = vmul.f32 0.2, %v295_v44 }
  0xb1   :  { %v316_v61 = vmul.f32 0.2, %v284_v55  ;;  %v320_v62 = vmul.f32 0.2, %v288_v56  ;;  %vm300_vm8 = vcmp.ge.f32.partialorder %v284_v55, 0.0  ;;  %vm304_vm9 = vcmp.ge.f32.partialorder %v288_v56, 0.0 }
  0xb2   :  { %v339_v51 = vsel %vm307_vm6, %v291_v43, %v323_v47  ;;  %v343_v52 = vsel %vm311_vm7, %v295_v44, %v327_v48 }
  0xb3   :  { %v485_v53 = vpack.c.bf16 %v339_v51, %v338_v49  ;;  %v495_v54 = vpack.c.bf16 %v343_v52, %v342_v50  ;;  %v332_v5 = vsel %vm300_vm8, %v284_v55, %v316_v61  ;;  %v336_v6 = vsel %vm304_vm9, %v288_v56, %v320_v62 }
  0xb5   :  { %505 = vst [vmem:[%s650_s3 + $0x20] sm:$0xff] %v485_v53   ;;  %v212_v57 = vpop.f32.mrf.mxu2  ;;  %v222_v58 = vpop.f32.mrf.mxu3 }
  0xb6   :  { %507 = vst [vmem:[%s650_s3 + $0x30] sm:$0xff] %v495_v54   ;;  %v194_v59 = vpop.f32.mrf.mxu0  ;;  %v204_v60 = vpop.f32.mrf.mxu1  ;;  %v292_v3 = vadd.f32 %v605_v18, %v212_v57  ;;  %v296_v4 = vadd.f32 %v605_v18, %v222_v58 }
  0xb7   :  { %v285_v63 = vadd.f32 %v605_v18, %v194_v59  ;;  %v289_v0 = vadd.f32 %v605_v18, %v204_v60 }
  0xb8   :  { %v324_v13 = vmul.f32 0.2, %v292_v3  ;;  %v328_v14 = vmul.f32 0.2, %v296_v4  ;;  %vm308_vm12 = vcmp.ge.f32.partialorder %v292_v3, 0.0  ;;  %vm312_vm13 = vcmp.ge.f32.partialorder %v296_v4, 0.0 }
  0xb9   :  { %vm301_vm10 = vcmp.ge.f32.partialorder %v285_v63, 0.0  ;;  %v317_v1 = vmul.f32 0.2, %v285_v63  ;;  %vm305_vm11 = vcmp.ge.f32.partialorder %v289_v0, 0.0  ;;  %v321_v2 = vmul.f32 0.2, %v289_v0 }
  0xba   :  { %v340_v20 = vsel %vm308_vm12, %v292_v3, %v324_v13  ;;  %v344_v21 = vsel %vm312_vm13, %v296_v4, %v328_v14 }
  0xbb   :  { %v333_v7 = vsel %vm301_vm10, %v285_v63, %v317_v1  ;;  %v337_v8 = vsel %vm305_vm11, %v289_v0, %v321_v2 }
  0xbc   :  { %v470_v9 = vpack.c.bf16 %v333_v7, %v332_v5  ;;  %v480_v10 = vpack.c.bf16 %v337_v8, %v336_v6 }
  0xbd   :  { %v214_v11 = vpop.f32.mrf.mxu2  ;;  %v224_v12 = vpop.f32.mrf.mxu3 }
  0xbe   :  { %502 = vst [vmem:[%s650_s3 + $0x8] sm:$0xff] %v470_v9   ;;  %v293_v15 = vadd.f32 %v605_v18, %v214_v11  ;;  %v297_v16 = vadd.f32 %v605_v18, %v224_v12 }
  0xbf   :  { %504 = vst [vmem:[%s650_s3 + $0x18] sm:$0xff] %v480_v10  }
  0xc0   :  { %vm309_vm14 = vcmp.ge.f32.partialorder %v293_v15, 0.0  ;;  %v325_v17 = vmul.f32 0.2, %v293_v15  ;;  %vm313_vm15 = vcmp.ge.f32.partialorder %v297_v16, 0.0  ;;  %v329_v19 = vmul.f32 0.2, %v297_v16 }
  0xc2   :  { %v341_v22 = vsel %vm309_vm14, %v293_v15, %v325_v17  ;;  %v345_v23 = vsel %vm313_vm15, %v297_v16, %v329_v19 }
  0xc3   :  { %v490_v24 = vpack.c.bf16 %v341_v22, %v340_v20  ;;  %v500_v25 = vpack.c.bf16 %v345_v23, %v344_v21 }
  0xc5   :  { %506 = vst [vmem:[%s650_s3 + $0x28] sm:$0xff] %v490_v24  }
  0xc6   :  { %508 = vst [vmem:[%s650_s3 + $0x38] sm:$0xff] %v500_v25  }

// kernel: discriminator_fcn_forward.7
= control target key start
LH: loop header
LB: loop body
LE: loop exit
PB: predicated region body
PF: predicated region fallthrough
CT: control target
= control target key end

     0   :  { %s301_s1 = inlined_call_operand.vmem [shape: bf16[128,128], index: 1, kind: input, shape index: {}]   ;;  %s302_s2 = inlined_call_operand.vmem [shape: f32[1,128], index: 2, kind: input, shape index: {}]   ;;  %s303_s0 = inlined_call_operand.vmem [shape: bf16[32,128], index: 0, kind: input, shape index: {}]   ;;  %s304_s3 = inlined_call_operand.vmem [shape: bf16[32,128], index: 3, kind: output, shape index: {}]  }
   0x1   :  { %v221_v0 = vld [vmem:[%s301_s1 + $0x38] sm:$0xff]  ;;  %v220_v1 = vld [vmem:[%s301_s1 + $0x30] sm:$0xff]  ;;  %v219_v2 = vld [vmem:[%s301_s1 + $0x28] sm:$0xff] }
   0x2   :  { %106 = vmatpush.bf16.msra.mxu0 %v221_v0  ;;  %233 = vmatpush.bf16.msra.mxu1 %v221_v0  ;;  %v218_v3 = vld [vmem:[%s301_s1 + $0x20] sm:$0xff]  ;;  %v217_v4 = vld [vmem:[%s301_s1 + $0x18] sm:$0xff]  ;;  %v216_v5 = vld [vmem:[%s301_s1 + $0x10] sm:$0xff] }
   0x3   :  { %v215_v6 = vld [vmem:[%s301_s1 + $0x8] sm:$0xff]  ;;  %v214_v7 = vld [vmem:[%s301_s1] sm:$0xff] }
   0x4   :  { %v212_v8 = vld [vmem:[%s303_s0] sm:$0xff]  ;;  %v213_v9 = vld [vmem:[%s303_s0 + $0x8] sm:$0xff] }
   0x5   :  { %v241_v12 = vld [vmem:[%s302_s2] ss:$0 sm:$0xff] }
   0x6   :  { %107 = vmatpush.bf16.msra.mxu0 %v220_v1  ;;  %234 = vmatpush.bf16.msra.mxu1 %v220_v1 }
   0xa   :  { %108 = vmatpush.bf16.msra.mxu0 %v219_v2  ;;  %235 = vmatpush.bf16.msra.mxu1 %v219_v2 }
   0xe   :  { %109 = vmatpush.bf16.msra.mxu0 %v218_v3  ;;  %236 = vmatpush.bf16.msra.mxu1 %v218_v3 }
  0x12   :  { %110 = vmatpush.bf16.msra.mxu0 %v217_v4  ;;  %237 = vmatpush.bf16.msra.mxu1 %v217_v4 }
  0x16   :  { %111 = vmatpush.bf16.msra.mxu0 %v216_v5  ;;  %238 = vmatpush.bf16.msra.mxu1 %v216_v5 }
  0x1a   :  { %112 = vmatpush.bf16.msra.mxu0 %v215_v6  ;;  %239 = vmatpush.bf16.msra.mxu1 %v215_v6 }
  0x1e   :  { %113 = vmatpush.bf16.msra.mxu0 %v214_v7  ;;  %240 = vmatpush.bf16.msra.mxu1 %v214_v7 }
  0x21   :  { %114 = vmatmul.bf16.vlgmr.msra.gmra.mxu0 %v212_v8  ;;  %119 = vmatmul.bf16.vlgmr.msra.gmra.mxu1 %v213_v9 }
  0x9e   :  { %v115_v10 = vpop.f32.mrf.mxu0  ;;  %v120_v11 = vpop.f32.mrf.mxu1 }
  0x9f   :  { %v144_v13 = vadd.f32 %v241_v12, %v115_v10  ;;  %v146_v14 = vadd.f32 %v241_v12, %v120_v11 }
  0xa1   :  { %v152_v17 = vmul.f32 0.2, %v144_v13  ;;  %v154_v18 = vmul.f32 0.2, %v146_v14  ;;  %vm148_vm0 = vcmp.ge.f32.partialorder %v144_v13, 0.0  ;;  %vm150_vm1 = vcmp.ge.f32.partialorder %v146_v14, 0.0 }
  0xa3   :  { %v156_v23 = vsel %vm148_vm0, %v144_v13, %v152_v17  ;;  %v158_v24 = vsel %vm150_vm1, %v146_v14, %v154_v18 }
  0xa6   :  { %v117_v15 = vpop.f32.mrf.mxu0  ;;  %v122_v16 = vpop.f32.mrf.mxu1 }
  0xa7   :  { %v145_v19 = vadd.f32 %v241_v12, %v117_v15  ;;  %v147_v20 = vadd.f32 %v241_v12, %v122_v16 }
  0xa9   :  { %vm149_vm2 = vcmp.ge.f32.partialorder %v145_v19, 0.0  ;;  %v153_v21 = vmul.f32 0.2, %v145_v19  ;;  %vm151_vm3 = vcmp.ge.f32.partialorder %v147_v20, 0.0  ;;  %v155_v22 = vmul.f32 0.2, %v147_v20 }
  0xab   :  { %v157_v25 = vsel %vm149_vm2, %v145_v19, %v153_v21  ;;  %v159_v26 = vsel %vm151_vm3, %v147_v20, %v155_v22 }
  0xac   :  { %v225_v27 = vpack.c.bf16 %v157_v25, %v156_v23  ;;  %v230_v28 = vpack.c.bf16 %v159_v26, %v158_v24 }
  0xae   :  { %226 = vst [vmem:[%s304_s3] sm:$0xff] %v225_v27  }
  0xaf   :  { %232 = vst [vmem:[%s304_s3 + $0x8] sm:$0xff] %v230_v28  }

// kernel: discriminator_fcn_forward.8
= control target key start
LH: loop header
LB: loop body
LE: loop exit
PB: predicated region body
PF: predicated region fallthrough
CT: control target
= control target key end

     0   :  { %s360_s1 = inlined_call_operand.vmem [shape: bf16[256,128], index: 1, kind: input, shape index: {}]   ;;  %s361_s0 = inlined_call_operand.vmem [shape: bf16[8,256], index: 0, kind: input, shape index: {}]   ;;  %s362_s2 = inlined_call_operand.vmem [shape: f32[1,128], index: 2, kind: input, shape index: {}]   ;;  %s363_s3 = inlined_call_operand.vmem [shape: bf16[8,128], index: 3, kind: output, shape index: {}]  }
   0x1   :  { %v273_v0 = vld [vmem:[%s360_s1 + $0x38] sm:$0xff]  ;;  %v272_v2 = vld [vmem:[%s360_s1 + $0x30] sm:$0xff]  ;;  %v271_v4 = vld [vmem:[%s360_s1 + $0x28] sm:$0xff] }
   0x2   :  { %v281_v1 = vld [vmem:[%s360_s1 + $0x78] sm:$0xff]  ;;  %156 = vmatpush.bf16.msra.mxu0 %v273_v0  ;;  %v280_v3 = vld [vmem:[%s360_s1 + $0x70] sm:$0xff]  ;;  %v279_v5 = vld [vmem:[%s360_s1 + $0x68] sm:$0xff] }
   0x3   :  { %169 = vmatpush.bf16.msra.mxu1 %v281_v1  ;;  %v270_v6 = vld [vmem:[%s360_s1 + $0x20] sm:$0xff]  ;;  %v269_v8 = vld [vmem:[%s360_s1 + $0x18] sm:$0xff]  ;;  %v268_v10 = vld [vmem:[%s360_s1 + $0x10] sm:$0xff] }
   0x4   :  { %v278_v7 = vld [vmem:[%s360_s1 + $0x60] sm:$0xff]  ;;  %v277_v9 = vld [vmem:[%s360_s1 + $0x58] sm:$0xff]  ;;  %v276_v11 = vld [vmem:[%s360_s1 + $0x50] sm:$0xff] }
   0x5   :  { %v267_v12 = vld [vmem:[%s360_s1 + $0x8] sm:$0xff]  ;;  %v20_v14 = vld [vmem:[%s361_s0] sm:$0xff] }
   0x6   :  { %157 = vmatpush.bf16.msra.mxu0 %v272_v2  ;;  %v275_v13 = vld [vmem:[%s360_s1 + $0x48] sm:$0xff]  ;;  %v54_v15 = vunpack.c.l.b16 %v20_v14  ;;  %v55_v16 = vunpack.c.h.b16 %v20_v14  ;;  %v266_v17 = vld [vmem:[%s360_s1] sm:$0xff] }
   0x7   :  { %170 = vmatpush.bf16.msra.mxu1 %v280_v3  ;;  %v274_v18 = vld [vmem:[%s360_s1 + $0x40] sm:$0xff] }
   0x8   :  { %v56_v19 = vpack.c.b16 %v54_v15, %v54_v15  ;;  %v57_v20 = vpack.c.b16 %v55_v16, %v55_v16  ;;  %v282_v21 = vld [vmem:[%s362_s2] ss:$0 sm:$0xff] }
   0xa   :  { %158 = vmatpush.bf16.msra.mxu0 %v271_v4 }
   0xb   :  { %171 = vmatpush.bf16.msra.mxu1 %v279_v5 }
   0xe   :  { %159 = vmatpush.bf16.msra.mxu0 %v270_v6 }
   0xf   :  { %172 = vmatpush.bf16.msra.mxu1 %v278_v7 }
  0x12   :  { %160 = vmatpush.bf16.msra.mxu0 %v269_v8 }
  0x13   :  { %173 = vmatpush.bf16.msra.mxu1 %v277_v9 }
  0x16   :  { %161 = vmatpush.bf16.msra.mxu0 %v268_v10 }
  0x17   :  { %174 = vmatpush.bf16.msra.mxu1 %v276_v11 }
  0x1a   :  { %162 = vmatpush.bf16.msra.mxu0 %v267_v12 }
  0x1b   :  { %175 = vmatpush.bf16.msra.mxu1 %v275_v13 }
  0x1e   :  { %163 = vmatpush.bf16.msra.mxu0 %v266_v17 }
  0x1f   :  { %176 = vmatpush.bf16.msra.mxu1 %v274_v18 }
  0x21   :  { %164 = vmatmul.bf16.vlgmr.msra.gmra.mxu0 %v56_v19 }
  0x22   :  { %177 = vmatmul.bf16.vlgmr.msra.gmra.mxu1 %v57_v20 }
  0x9e   :  { %v165_v22 = vpop.f32.mrf.mxu0 }
  0x9f   :  { %v178_v23 = vpop.f32.mrf.mxu1 }
  0xa0   :  { %v179_v24 = vadd.f32 %v178_v23, %v165_v22 }
  0xa2   :  { %v192_v25 = vadd.f32 %v282_v21, %v179_v24 }
  0xa4   :  { %vm193_vm0 = vcmp.ge.f32.partialorder %v192_v25, 0.0  ;;  %v194_v26 = vmul.f32 0.2, %v192_v25 }
  0xa6   :  { %v195_v27 = vsel %vm193_vm0, %v192_v25, %v194_v26  ;;  %v167_v29 = vpop.f32.mrf.mxu0 }
  0xa7   :  { %v196_v28 = vpack.c.bf16 %v195_v27, %v195_v27  ;;  %v180_v30 = vpop.f32.mrf.mxu1 }
  0xa9   :  { %197 = vst [vmem:[%s363_s3] sm:$0xf] %v196_v28 }

// kernel: discriminator_fcn_forward.9
= control target key start
LH: loop header
LB: loop body
LE: loop exit
PB: predicated region body
PF: predicated region fallthrough
CT: control target
= control target key end

     0   :  { %s714_s12 = smov 0   ;;  %s716_s13 = smov 0   ;;  %s780_s0 = inlined_call_operand.vmem [shape: bf16[8,512], index: 0, kind: input, shape index: {}]   ;;  %s781_s1 = inlined_call_operand.vmem [shape: bf16[512,128], index: 1, kind: input, shape index: {}]   ;;  %s782_s2 = inlined_call_operand.vmem [shape: f32[1,128], index: 2, kind: input, shape index: {}]   ;;  %s783_s3 = inlined_call_operand.vmem [shape: bf16[8,128], index: 3, kind: output, shape index: {}]  }
   0x1   :  { %s718_s14 = smov 0  }
   0x2 LB: > { %s25_s15 = sadd.s32 1, %s687_s13  ;;  %p553_p0 = scmp.ge.s32.totalorder %s691_s14, 1  ;;  %s691_s14 = sphi %s718_s14, %s13_s14   ;;  %s687_s13 = sphi %s716_s13, %s785_s13   ;;  %s683_s12 = sphi %s714_s12, %s784_s12  }
   0x3   : > { %p26_p1 = scmp.ge.s32.totalorder %s25_s15, 2  ;;  %p189_p2 = scmp.lt.s32.totalorder %s691_s14, 3 }
   0x5   : > { %s787_s15 = smov (%p26_p1, %s25_s15), 0  ;;  %p190_p3 = pnand %p553_p0, %p189_p2 }
   0x6   : > { %s554_s16 = sshll.u32 (!%p190_p3), %s683_s12, 1  ;;  %s556_s17 = sshll.u32 (!%p190_p3), %s683_s12, 5 }
   0x7   : > { %193 = sbr.rel (%p190_p3) target bundleno = 201 (0xc9), region = 32  ;;  %p233_p4 = scmp.lt.s32.totalorder (!%p190_p3), %s554_s16, 3 }
   0x8   : > { %p241_p5 = scmp.lt.s32.totalorder (!%p190_p3), %s556_s17, 63  ;;  %p558_p6 = scmp.ne.s32.totalorder (!%p190_p3), %s683_s12, 0 }
   0xc   : > { %s789_s16 = smov (!%p233_p4, %s554_s16), 3  ;;  %s791_s17 = smov (!%p241_p5, %s556_s17), 63 }
   0xd   : > { %s555_s18 = sshll.u32 %s789_s16, 2  ;;  %s557_s22 = sshll.u32 %s791_s17, 2 }
   0xe   : > { %s739_s21 = scalar_lea.vmem %s780_s0, %s555_s18  ;;  %s744_s25 = scalar_lea.vmem %s781_s1, %s557_s22 }
   0xf   : > { %262 = sbr.rel (%p558_p6) target bundleno = 22 (0x16), region = 36 }
  0x14   : > { %v693_v0 = vmov 0.0  }
  0x15   : > { %263 = vst [vmem:[#allocation2] sm:$0xff] %v693_v0 }
  0x16 PF: > { %v634_v1 = vld [vmem:[%s744_s25 + $0x38] sm:$0xff]  ;;  %v633_v3 = vld [vmem:[%s744_s25 + $0x30] sm:$0xff]  ;;  %v632_v5 = vld [vmem:[%s744_s25 + $0x28] sm:$0xff]  ;;  %p623_p7 = scmp.ne.s32.totalorder %s683_s12, 1 }
  0x17   : > { %v642_v2 = vld [vmem:[%s744_s25 + $0x78] sm:$0xff]  ;;  %401 = vmatpush.bf16.msra.mxu0 %v634_v1  ;;  %v641_v4 = vld [vmem:[%s744_s25 + $0x70] sm:$0xff]  ;;  %v640_v6 = vld [vmem:[%s744_s25 + $0x68] sm:$0xff] }
  0x18   : > { %414 = vmatpush.bf16.msra.mxu1 %v642_v2  ;;  %v631_v7 = vld [vmem:[%s744_s25 + $0x20] sm:$0xff]  ;;  %v630_v9 = vld [vmem:[%s744_s25 + $0x18] sm:$0xff]  ;;  %v629_v11 = vld [vmem:[%s744_s25 + $0x10] sm:$0xff] }
  0x19   : > { %v639_v8 = vld [vmem:[%s744_s25 + $0x60] sm:$0xff]  ;;  %v638_v10 = vld [vmem:[%s744_s25 + $0x58] sm:$0xff]  ;;  %v637_v12 = vld [vmem:[%s744_s25 + $0x50] sm:$0xff] }
  0x1a   : > { %v628_v13 = vld [vmem:[%s744_s25 + $0x8] sm:$0xff]  ;;  %v265_v15 = vld [vmem:[%s739_s21] sm:$0xff] }
  0x1b   : > { %402 = vmatpush.bf16.msra.mxu0 %v633_v3  ;;  %v636_v14 = vld [vmem:[%s744_s25 + $0x48] sm:$0xff]  ;;  %v299_v16 = vunpack.c.l.b16 %v265_v15  ;;  %v300_v17 = vunpack.c.h.b16 %v265_v15  ;;  %v627_v18 = vld [vmem:[%s744_s25] sm:$0xff] }
  0x1c   : > { %415 = vmatpush.bf16.msra.mxu1 %v641_v4  ;;  %v635_v19 = vld [vmem:[%s744_s25 + $0x40] sm:$0xff] }
  0x1d   : > { %v301_v20 = vpack.c.b16 %v299_v16, %v299_v16  ;;  %v302_v21 = vpack.c.b16 %v300_v17, %v300_v17  ;;  %v264_v23 = vld [vmem:[#allocation2] sm:$0xff] }
  0x1f   : > { %403 = vmatpush.bf16.msra.mxu0 %v632_v5 }
  0x20   : > { %416 = vmatpush.bf16.msra.mxu1 %v640_v6 }
  0x23   : > { %404 = vmatpush.bf16.msra.mxu0 %v631_v7 }
  0x24   : > { %417 = vmatpush.bf16.msra.mxu1 %v639_v8 }
  0x27   : > { %405 = vmatpush.bf16.msra.mxu0 %v630_v9 }
  0x28   : > { %418 = vmatpush.bf16.msra.mxu1 %v638_v10 }
  0x2b   : > { %406 = vmatpush.bf16.msra.mxu0 %v629_v11 }
  0x2c   : > { %419 = vmatpush.bf16.msra.mxu1 %v637_v12 }
  0x2f   : > { %407 = vmatpush.bf16.msra.mxu0 %v628_v13 }
  0x30   : > { %420 = vmatpush.bf16.msra.mxu1 %v636_v14 }
  0x33   : > { %408 = vmatpush.bf16.msra.mxu0 %v627_v18 }
  0x34   : > { %421 = vmatpush.bf16.msra.mxu1 %v635_v19 }
  0x36   : > { %409 = vmatmul.bf16.vlgmr.msra.gmra.mxu0 %v301_v20 }
  0x37   : > { %422 = vmatmul.bf16.vlgmr.msra.gmra.mxu1 %v302_v21 }
  0xb3   : > { %v410_v22 = vpop.f32.mrf.mxu0 }
  0xb4   : > { %v423_v24 = vpop.f32.mrf.mxu1 }
  0xb5   : > { %v424_v25 = vadd.f32 %v423_v24, %v410_v22 }
  0xb7   : > { %v427_v26 = vadd.f32 %v424_v25, %v264_v23 }
  0xb8   : > { %432 = sbr.rel (%p623_p7) target bundleno = 201 (0xc9), region = 40 }
  0xb9   : > { %428 = vst [vmem:[#allocation2] sm:$0xff] %v427_v26 }
  0xbb   : > { %v412_v27 = vpop.f32.mrf.mxu0 }
  0xbc   : > { %v425_v28 = vpop.f32.mrf.mxu1 }
  0xbd   : > { %v668_v30 = vld [vmem:[%s782_s2] ss:$0 sm:$0xff] }
  0xc0   : > { %v433_v29 = vld [vmem:[#allocation2] sm:$0xff] }
  0xc1   : > { %v438_v31 = vadd.f32 %v668_v30, %v433_v29 }
  0xc3   : > { %vm439_vm0 = vcmp.ge.f32.partialorder %v438_v31, 0.0  ;;  %v440_v32 = vmul.f32 0.2, %v438_v31 }
  0xc5   : > { %v441_v33 = vsel %vm439_vm0, %v438_v31, %v440_v32 }
  0xc6   : > { %v442_v34 = vpack.c.bf16 %v441_v33, %v441_v33 }
  0xc8   : > { %443 = vst [vmem:[%s783_s3] sm:$0xf] %v442_v34 }
  0xc9 PF: > { %s13_s14 = sadd.s32 1, %s691_s14   ;;  %s784_s12 = smov %s687_s13 }
  0xca   : > { %p10_p8 = scmp.ge.s32.totalorder %s13_s14, 4   ;;  %s785_s13 = smov %s787_s15 }
  0xcc   :  { %12 = sbr.rel (!%p10_p8) target bundleno = 2 (0x2), region = 76 }

// kernel: discriminator_fcn_forward.10
= control target key start
LH: loop header
LB: loop body
LE: loop exit
PB: predicated region body
PF: predicated region fallthrough
CT: control target
= control target key end

     0   :  { %s714_s12 = smov 0   ;;  %s716_s13 = smov 0   ;;  %s780_s0 = inlined_call_operand.vmem [shape: bf16[8,1024], index: 0, kind: input, shape index: {}]   ;;  %s781_s1 = inlined_call_operand.vmem [shape: bf16[1024,128], index: 1, kind: input, shape index: {}]   ;;  %s782_s2 = inlined_call_operand.vmem [shape: f32[1,128], index: 2, kind: input, shape index: {}]   ;;  %s783_s3 = inlined_call_operand.vmem [shape: bf16[8,128], index: 3, kind: output, shape index: {}]  }
   0x1   :  { %s718_s14 = smov 0  }
   0x2 LB: > { %s25_s15 = sadd.s32 1, %s687_s13  ;;  %p553_p0 = scmp.ge.s32.totalorder %s691_s14, 1  ;;  %s691_s14 = sphi %s718_s14, %s13_s14   ;;  %s687_s13 = sphi %s716_s13, %s785_s13   ;;  %s683_s12 = sphi %s714_s12, %s784_s12  }
   0x3   : > { %p26_p1 = scmp.ge.s32.totalorder %s25_s15, 4  ;;  %p189_p2 = scmp.lt.s32.totalorder %s691_s14, 5 }
   0x5   : > { %s787_s15 = smov (%p26_p1, %s25_s15), 0  ;;  %p190_p3 = pnand %p553_p0, %p189_p2 }
   0x6   : > { %s554_s16 = sshll.u32 (!%p190_p3), %s683_s12, 1  ;;  %s556_s17 = sshll.u32 (!%p190_p3), %s683_s12, 5 }
   0x7   : > { %193 = sbr.rel (%p190_p3) target bundleno = 201 (0xc9), region = 32  ;;  %p233_p4 = scmp.lt.s32.totalorder (!%p190_p3), %s554_s16, 7 }
   0x8   : > { %p241_p5 = scmp.lt.s32.totalorder (!%p190_p3), %s556_s17, 127  ;;  %p558_p6 = scmp.ne.s32.totalorder (!%p190_p3), %s683_s12, 0 }
   0xc   : > { %s789_s16 = smov (!%p233_p4, %s554_s16), 7  ;;  %s791_s17 = smov (!%p241_p5, %s556_s17), 127 }
   0xd   : > { %s555_s18 = sshll.u32 %s789_s16, 2  ;;  %s557_s22 = sshll.u32 %s791_s17, 2 }
   0xe   : > { %s739_s21 = scalar_lea.vmem %s780_s0, %s555_s18  ;;  %s744_s25 = scalar_lea.vmem %s781_s1, %s557_s22 }
   0xf   : > { %262 = sbr.rel (%p558_p6) target bundleno = 22 (0x16), region = 36 }
  0x14   : > { %v693_v0 = vmov 0.0  }
  0x15   : > { %263 = vst [vmem:[#allocation2] sm:$0xff] %v693_v0 }
  0x16 PF: > { %v634_v1 = vld [vmem:[%s744_s25 + $0x38] sm:$0xff]  ;;  %v633_v3 = vld [vmem:[%s744_s25 + $0x30] sm:$0xff]  ;;  %v632_v5 = vld [vmem:[%s744_s25 + $0x28] sm:$0xff]  ;;  %p623_p7 = scmp.ne.s32.totalorder %s683_s12, 3 }
  0x17   : > { %v642_v2 = vld [vmem:[%s744_s25 + $0x78] sm:$0xff]  ;;  %401 = vmatpush.bf16.msra.mxu0 %v634_v1  ;;  %v641_v4 = vld [vmem:[%s744_s25 + $0x70] sm:$0xff]  ;;  %v640_v6 = vld [vmem:[%s744_s25 + $0x68] sm:$0xff] }
  0x18   : > { %414 = vmatpush.bf16.msra.mxu1 %v642_v2  ;;  %v631_v7 = vld [vmem:[%s744_s25 + $0x20] sm:$0xff]  ;;  %v630_v9 = vld [vmem:[%s744_s25 + $0x18] sm:$0xff]  ;;  %v629_v11 = vld [vmem:[%s744_s25 + $0x10] sm:$0xff] }
  0x19   : > { %v639_v8 = vld [vmem:[%s744_s25 + $0x60] sm:$0xff]  ;;  %v638_v10 = vld [vmem:[%s744_s25 + $0x58] sm:$0xff]  ;;  %v637_v12 = vld [vmem:[%s744_s25 + $0x50] sm:$0xff] }
  0x1a   : > { %v628_v13 = vld [vmem:[%s744_s25 + $0x8] sm:$0xff]  ;;  %v265_v15 = vld [vmem:[%s739_s21] sm:$0xff] }
  0x1b   : > { %402 = vmatpush.bf16.msra.mxu0 %v633_v3  ;;  %v636_v14 = vld [vmem:[%s744_s25 + $0x48] sm:$0xff]  ;;  %v299_v16 = vunpack.c.l.b16 %v265_v15  ;;  %v300_v17 = vunpack.c.h.b16 %v265_v15  ;;  %v627_v18 = vld [vmem:[%s744_s25] sm:$0xff] }
  0x1c   : > { %415 = vmatpush.bf16.msra.mxu1 %v641_v4  ;;  %v635_v19 = vld [vmem:[%s744_s25 + $0x40] sm:$0xff] }
  0x1d   : > { %v301_v20 = vpack.c.b16 %v299_v16, %v299_v16  ;;  %v302_v21 = vpack.c.b16 %v300_v17, %v300_v17  ;;  %v264_v23 = vld [vmem:[#allocation2] sm:$0xff] }
  0x1f   : > { %403 = vmatpush.bf16.msra.mxu0 %v632_v5 }
  0x20   : > { %416 = vmatpush.bf16.msra.mxu1 %v640_v6 }
  0x23   : > { %404 = vmatpush.bf16.msra.mxu0 %v631_v7 }
  0x24   : > { %417 = vmatpush.bf16.msra.mxu1 %v639_v8 }
  0x27   : > { %405 = vmatpush.bf16.msra.mxu0 %v630_v9 }
  0x28   : > { %418 = vmatpush.bf16.msra.mxu1 %v638_v10 }
  0x2b   : > { %406 = vmatpush.bf16.msra.mxu0 %v629_v11 }
  0x2c   : > { %419 = vmatpush.bf16.msra.mxu1 %v637_v12 }
  0x2f   : > { %407 = vmatpush.bf16.msra.mxu0 %v628_v13 }
  0x30   : > { %420 = vmatpush.bf16.msra.mxu1 %v636_v14 }
  0x33   : > { %408 = vmatpush.bf16.msra.mxu0 %v627_v18 }
  0x34   : > { %421 = vmatpush.bf16.msra.mxu1 %v635_v19 }
  0x36   : > { %409 = vmatmul.bf16.vlgmr.msra.gmra.mxu0 %v301_v20 }
  0x37   : > { %422 = vmatmul.bf16.vlgmr.msra.gmra.mxu1 %v302_v21 }
  0xb3   : > { %v410_v22 = vpop.f32.mrf.mxu0 }
  0xb4   : > { %v423_v24 = vpop.f32.mrf.mxu1 }
  0xb5   : > { %v424_v25 = vadd.f32 %v423_v24, %v410_v22 }
  0xb7   : > { %v427_v26 = vadd.f32 %v424_v25, %v264_v23 }
  0xb8   : > { %432 = sbr.rel (%p623_p7) target bundleno = 201 (0xc9), region = 40 }
  0xb9   : > { %428 = vst [vmem:[#allocation2] sm:$0xff] %v427_v26 }
  0xbb   : > { %v412_v27 = vpop.f32.mrf.mxu0 }
  0xbc   : > { %v425_v28 = vpop.f32.mrf.mxu1 }
  0xbd   : > { %v668_v30 = vld [vmem:[%s782_s2] ss:$0 sm:$0xff] }
  0xc0   : > { %v433_v29 = vld [vmem:[#allocation2] sm:$0xff] }
  0xc1   : > { %v438_v31 = vadd.f32 %v668_v30, %v433_v29 }
  0xc3   : > { %vm439_vm0 = vcmp.ge.f32.partialorder %v438_v31, 0.0  ;;  %v440_v32 = vmul.f32 0.2, %v438_v31 }
  0xc5   : > { %v441_v33 = vsel %vm439_vm0, %v438_v31, %v440_v32 }
  0xc6   : > { %v442_v34 = vpack.c.bf16 %v441_v33, %v441_v33 }
  0xc8   : > { %443 = vst [vmem:[%s783_s3] sm:$0xf] %v442_v34 }
  0xc9 PF: > { %s13_s14 = sadd.s32 1, %s691_s14   ;;  %s784_s12 = smov %s687_s13 }
  0xca   : > { %p10_p8 = scmp.ge.s32.totalorder %s13_s14, 6   ;;  %s785_s13 = smov %s787_s15 }
  0xcc   :  { %12 = sbr.rel (!%p10_p8) target bundleno = 2 (0x2), region = 76 }

// kernel: discriminator_fcn_forward.11
= control target key start
LH: loop header
LB: loop body
LE: loop exit
PB: predicated region body
PF: predicated region fallthrough
CT: control target
= control target key end

     0   :  { %s710_s12 = smov 0   ;;  %s712_s13 = smov 0   ;;  %s776_s0 = inlined_call_operand.vmem [shape: bf16[8,512], index: 0, kind: input, shape index: {}]   ;;  %s777_s1 = inlined_call_operand.vmem [shape: bf16[512,128], index: 1, kind: input, shape index: {}]   ;;  %s778_s2 = inlined_call_operand.vmem [shape: f32[1,128], index: 2, kind: input, shape index: {}]   ;;  %s779_s3 = inlined_call_operand.vmem [shape: f32[8,128], index: 3, kind: output, shape index: {}]  }
   0x1   :  { %s714_s14 = smov 0  }
   0x2 LB: > { %s25_s15 = sadd.s32 1, %s683_s13  ;;  %p549_p0 = scmp.ge.s32.totalorder %s687_s14, 1  ;;  %s687_s14 = sphi %s714_s14, %s13_s14   ;;  %s683_s13 = sphi %s712_s13, %s781_s13   ;;  %s679_s12 = sphi %s710_s12, %s780_s12  }
   0x3   : > { %p26_p1 = scmp.ge.s32.totalorder %s25_s15, 2  ;;  %p189_p2 = scmp.lt.s32.totalorder %s687_s14, 3 }
   0x5   : > { %s783_s15 = smov (%p26_p1, %s25_s15), 0  ;;  %p190_p3 = pnand %p549_p0, %p189_p2 }
   0x6   : > { %s550_s16 = sshll.u32 (!%p190_p3), %s679_s12, 1  ;;  %s552_s17 = sshll.u32 (!%p190_p3), %s679_s12, 5 }
   0x7   : > { %193 = sbr.rel (%p190_p3) target bundleno = 196 (0xc4), region = 32  ;;  %p233_p4 = scmp.lt.s32.totalorder (!%p190_p3), %s550_s16, 3 }
   0x8   : > { %p241_p5 = scmp.lt.s32.totalorder (!%p190_p3), %s552_s17, 63  ;;  %p554_p6 = scmp.ne.s32.totalorder (!%p190_p3), %s679_s12, 0 }
   0xc   : > { %s785_s16 = smov (!%p233_p4, %s550_s16), 3  ;;  %s787_s17 = smov (!%p241_p5, %s552_s17), 63 }
   0xd   : > { %s551_s18 = sshll.u32 %s785_s16, 2  ;;  %s553_s22 = sshll.u32 %s787_s17, 2 }
   0xe   : > { %s735_s21 = scalar_lea.vmem %s776_s0, %s551_s18  ;;  %s740_s25 = scalar_lea.vmem %s777_s1, %s553_s22 }
   0xf   : > { %262 = sbr.rel (%p554_p6) target bundleno = 22 (0x16), region = 36 }
  0x14   : > { %v689_v0 = vmov 0.0  }
  0x15   : > { %263 = vst [vmem:[#allocation2] sm:$0xff] %v689_v0 }
  0x16 PF: > { %v630_v1 = vld [vmem:[%s740_s25 + $0x38] sm:$0xff]  ;;  %v629_v3 = vld [vmem:[%s740_s25 + $0x30] sm:$0xff]  ;;  %v628_v5 = vld [vmem:[%s740_s25 + $0x28] sm:$0xff]  ;;  %p619_p7 = scmp.ne.s32.totalorder %s679_s12, 1 }
  0x17   : > { %v638_v2 = vld [vmem:[%s740_s25 + $0x78] sm:$0xff]  ;;  %401 = vmatpush.bf16.msra.mxu0 %v630_v1  ;;  %v637_v4 = vld [vmem:[%s740_s25 + $0x70] sm:$0xff]  ;;  %v636_v6 = vld [vmem:[%s740_s25 + $0x68] sm:$0xff] }
  0x18   : > { %414 = vmatpush.bf16.msra.mxu1 %v638_v2  ;;  %v627_v7 = vld [vmem:[%s740_s25 + $0x20] sm:$0xff]  ;;  %v626_v9 = vld [vmem:[%s740_s25 + $0x18] sm:$0xff]  ;;  %v625_v11 = vld [vmem:[%s740_s25 + $0x10] sm:$0xff] }
  0x19   : > { %v635_v8 = vld [vmem:[%s740_s25 + $0x60] sm:$0xff]  ;;  %v634_v10 = vld [vmem:[%s740_s25 + $0x58] sm:$0xff]  ;;  %v633_v12 = vld [vmem:[%s740_s25 + $0x50] sm:$0xff] }
  0x1a   : > { %v624_v13 = vld [vmem:[%s740_s25 + $0x8] sm:$0xff]  ;;  %v265_v15 = vld [vmem:[%s735_s21] sm:$0xff] }
  0x1b   : > { %402 = vmatpush.bf16.msra.mxu0 %v629_v3  ;;  %v632_v14 = vld [vmem:[%s740_s25 + $0x48] sm:$0xff]  ;;  %v299_v16 = vunpack.c.l.b16 %v265_v15  ;;  %v300_v17 = vunpack.c.h.b16 %v265_v15  ;;  %v623_v18 = vld [vmem:[%s740_s25] sm:$0xff] }
  0x1c   : > { %415 = vmatpush.bf16.msra.mxu1 %v637_v4  ;;  %v631_v19 = vld [vmem:[%s740_s25 + $0x40] sm:$0xff] }
  0x1d   : > { %v301_v20 = vpack.c.b16 %v299_v16, %v299_v16  ;;  %v302_v21 = vpack.c.b16 %v300_v17, %v300_v17  ;;  %v264_v23 = vld [vmem:[#allocation2] sm:$0xff] }
  0x1f   : > { %403 = vmatpush.bf16.msra.mxu0 %v628_v5 }
  0x20   : > { %416 = vmatpush.bf16.msra.mxu1 %v636_v6 }
  0x23   : > { %404 = vmatpush.bf16.msra.mxu0 %v627_v7 }
  0x24   : > { %417 = vmatpush.bf16.msra.mxu1 %v635_v8 }
  0x27   : > { %405 = vmatpush.bf16.msra.mxu0 %v626_v9 }
  0x28   : > { %418 = vmatpush.bf16.msra.mxu1 %v634_v10 }
  0x2b   : > { %406 = vmatpush.bf16.msra.mxu0 %v625_v11 }
  0x2c   : > { %419 = vmatpush.bf16.msra.mxu1 %v633_v12 }
  0x2f   : > { %407 = vmatpush.bf16.msra.mxu0 %v624_v13 }
  0x30   : > { %420 = vmatpush.bf16.msra.mxu1 %v632_v14 }
  0x33   : > { %408 = vmatpush.bf16.msra.mxu0 %v623_v18 }
  0x34   : > { %421 = vmatpush.bf16.msra.mxu1 %v631_v19 }
  0x36   : > { %409 = vmatmul.bf16.vlgmr.msra.gmra.mxu0 %v301_v20 }
  0x37   : > { %422 = vmatmul.bf16.vlgmr.msra.gmra.mxu1 %v302_v21 }
  0xb3   : > { %v410_v22 = vpop.f32.mrf.mxu0 }
  0xb4   : > { %v423_v24 = vpop.f32.mrf.mxu1 }
  0xb5   : > { %v424_v25 = vadd.f32 %v423_v24, %v410_v22 }
  0xb7   : > { %v427_v26 = vadd.f32 %v424_v25, %v264_v23 }
  0xb8   : > { %432 = sbr.rel (%p619_p7) target bundleno = 196 (0xc4), region = 40 }
  0xb9   : > { %428 = vst [vmem:[#allocation2] sm:$0xff] %v427_v26 }
  0xbb   : > { %v412_v27 = vpop.f32.mrf.mxu0 }
  0xbc   : > { %v425_v28 = vpop.f32.mrf.mxu1 }
  0xbd   : > { %v664_v30 = vld [vmem:[%s778_s2] ss:$0 sm:$0xff] }
  0xc0   : > { %v433_v29 = vld [vmem:[#allocation2] sm:$0xff] }
  0xc1   : > { %v438_v31 = vadd.f32 %v664_v30, %v433_v29 }
  0xc3   : > { %439 = vst [vmem:[%s779_s3] sm:$0xff] %v438_v31 }
  0xc4 PF: > { %s13_s14 = sadd.s32 1, %s687_s14   ;;  %s780_s12 = smov %s683_s13 }
  0xc5   : > { %p10_p8 = scmp.ge.s32.totalorder %s13_s14, 4   ;;  %s781_s13 = smov %s783_s15 }
  0xc7   :  { %12 = sbr.rel (!%p10_p8) target bundleno = 2 (0x2), region = 76 }

</bundles_post_ra>
